<compile_context>
chip_gen: v7x
topology: tpu7x:2x2x1
jax: 0.10.0
libtpu: 0.0.40
codegen_flags: <defaults>
</compile_context>

<pallas_src>
import functools

import jax
import jax.numpy as jnp
from jax.experimental import pallas as pl
from jax.experimental.pallas import tpu as pltpu

HIDDEN = 32
NEG_INF = -1e30


# ----------------------------------------------------------------------------
# tile selection (dst-row tiles)
# ----------------------------------------------------------------------------
def _pick_tile(n):
    """Full array for small graphs; otherwise a 128-aligned divisor of N."""
    if n <= 256:
        return n
    for tm in (256, 128):          # 256 fine on v5e/v6e; 128 keeps v7x (64 MiB VMEM) happy
        if n % tm == 0:
            return tm
    return n                       # fallback: fully resident single step


# ----------------------------------------------------------------------------
# generic dense linear kernel (matmul + bias + act), whole-array resident
# ----------------------------------------------------------------------------
def _linear_kernel(x_ref, w_ref, b_ref, o_ref, *, activation):
    y = jnp.dot(x_ref[...].astype(jnp.bfloat16), w_ref[...].astype(jnp.bfloat16),
                preferred_element_type=jnp.float32)
    y = y + b_ref[...]
    if activation == "relu":
        y = jnp.maximum(y, 0.0)
    elif activation == "sigmoid":
        y = 1.0 / (1.0 + jnp.exp(-y))
    o_ref[...] = y


def linear(x, w, b, activation=None):
    x = x.astype(jnp.float32)
    w = w.astype(jnp.float32)
    b2 = b.reshape(1, -1).astype(jnp.float32)
    kern = functools.partial(_linear_kernel, activation=activation)
    return pl.pallas_call(
        kern,
        out_shape=jax.ShapeDtypeStruct((x.shape[0], w.shape[1]), jnp.float32),
        in_specs=[pl.BlockSpec(memory_space=pltpu.MemorySpace.VMEM)] * 3,
        out_specs=pl.BlockSpec(memory_space=pltpu.MemorySpace.VMEM),
    )(x, w, b2)


# ----------------------------------------------------------------------------
# GAT stage A: shared linear projection + fused attention-vector matmul
# ----------------------------------------------------------------------------
def _project_kernel(x_ref, w_ref, acat_ref, xs_ref, asrct_ref, adst_ref, *, heads):
    # x_ref: [TM, F_in] bf16, w_ref: [F_in, H*C] bf16, acat_ref: [H*C, 2H] f32
    xs = jnp.dot(x_ref[...], w_ref[...], preferred_element_type=jnp.float32)   # [TM, H*C]
    a = jnp.dot(xs, acat_ref[...], preferred_element_type=jnp.float32)         # [TM, 2H]
    xs_ref[...] = xs.astype(jnp.bfloat16)
    asrct_ref[...] = jnp.transpose(a[:, :heads])     # [H, TM] -- single XLU transpose
    adst_ref[...] = a[:, heads:]                     # [TM, H]


# ----------------------------------------------------------------------------
# GAT stage B: attention softmax + value aggregation, tiled over dst rows
# ----------------------------------------------------------------------------
def _attn_kernel(*refs, heads, out_ch, concat, relu, has_edge_alpha):
    if has_edge_alpha:
        adst_ref, asrct_ref, xs_ref, adj_ref, b_ref, ea_ref, o_ref = refs
    else:
        adst_ref, asrct_ref, xs_ref, adj_ref, b_ref, o_ref = refs
        ea_ref = None

    a_d = adst_ref[...]                    # [TM, H]  f32
    a_s_t = asrct_ref[...]                 # [H, N]   f32
    xs = xs_ref[...]                       # [N, H*C] bf16 (source features)
    edge_mask = adj_ref[...] > 0           # [TM, N]  (bf16 adj)

    head_outs = []
    mean_acc = None
    for h in range(heads):
        # logits[i, j] = a_dst_i + a_src_j (+ a_edge_ij)   (dst rows, src cols)
        logits = a_d[:, h:h + 1] + a_s_t[h:h + 1, :]                 # [TM, N]
        if has_edge_alpha:
            logits = logits + ea_ref[h].astype(jnp.float32)
        logits = jnp.where(logits > 0, logits, 0.2 * logits)         # LeakyReLU(0.2)
        logits = jnp.where(edge_mask, logits, NEG_INF)               # mask non-edges
        m = jnp.max(logits, axis=1, keepdims=True)
        p = jnp.exp(logits - m)                                      # exactly 0 on non-edges
        denom = jnp.sum(p, axis=1, keepdims=True)                    # >= 1 (self-loops)
        out_h = jnp.dot(p.astype(jnp.bfloat16),
                        xs[:, h * out_ch:(h + 1) * out_ch],
                        preferred_element_type=jnp.float32)          # [TM, C]
        out_h = out_h * pl.reciprocal(denom, approx=True)            # deferred softmax norm
        if concat:
            head_outs.append(out_h)
        else:
            mean_acc = out_h if mean_acc is None else mean_acc + out_h

    if concat:
        y = jnp.concatenate(head_outs, axis=-1) + b_ref[...]
    else:
        y = mean_acc * (1.0 / heads) + b_ref[...]
    if relu:
        y = jnp.maximum(y, 0.0)
    o_ref[...] = y                         # single lane-dense full-width store


def _attn_vmem_limit(n, tm, heads, hc, out_dim, has_ea):
    blocks = (tm * heads * 4            # a_dst tile
              + heads * n * 4           # a_src^T (full)
              + n * hc * 2              # xs (full, bf16)
              + tm * n * 2              # adj tile (bf16)
              + out_dim * 4             # bias
              + tm * out_dim * 4        # output tile
              + (heads * tm * n * 2 if has_ea else 0))
    scratch = 6 * tm * n * 4            # logits / p / mask temporaries
    est = 2 * blocks + scratch          # double-buffered pipeline
    return int(min(max(est + (4 << 20), 8 << 20), 48 << 20))


def gat_layer(x, p, adj_bf16, ealpha_bf16, *, heads, out_ch, concat, relu):
    n, f_in = x.shape
    hc = heads * out_ch
    out_dim = hc if concat else out_ch
    tm = _pick_tile(n)
    grid = (n // tm,)
    par = pltpu.CompilerParams(dimension_semantics=("parallel",))

    # ---- stage A: projection (row-tiled) ----
    xs_bf, a_src_t, a_dst = pl.pallas_call(
        functools.partial(_project_kernel, heads=heads),
        out_shape=(jax.ShapeDtypeStruct((n, hc), jnp.bfloat16),
                   jax.ShapeDtypeStruct((heads, n), jnp.float32),
                   jax.ShapeDtypeStruct((n, heads), jnp.float32)),
        grid=grid,
        in_specs=[pl.BlockSpec((tm, f_in), lambda i: (i, 0)),
                  pl.BlockSpec((f_in, hc), lambda i: (0, 0)),
                  pl.BlockSpec((hc, 2 * heads), lambda i: (0, 0))],
        out_specs=(pl.BlockSpec((tm, hc), lambda i: (i, 0)),
                   pl.BlockSpec((heads, tm), lambda i: (0, i)),
                   pl.BlockSpec((tm, heads), lambda i: (i, 0))),
        compiler_params=par,
    )(x.astype(jnp.bfloat16), p["w"].astype(jnp.bfloat16), p["a_cat"])

    # ---- stage B: attention (tiled over dst rows, softmax rows independent) ----
    has_ea = ealpha_bf16 is not None
    in_specs = [pl.BlockSpec((tm, heads), lambda i: (i, 0)),     # a_dst
                pl.BlockSpec((heads, n), lambda i: (0, 0)),      # a_src^T (resident)
                pl.BlockSpec((n, hc), lambda i: (0, 0)),         # xs sources (resident)
                pl.BlockSpec((tm, n), lambda i: (i, 0)),         # adj tile
                pl.BlockSpec((1, out_dim), lambda i: (0, 0))]    # bias
    args = [a_dst, a_src_t, xs_bf, adj_bf16, p["bias"].reshape(1, -1)]
    if has_ea:
        in_specs.append(pl.BlockSpec((heads, tm, n), lambda i: (0, i, 0)))
        args.append(ealpha_bf16)

    kern = functools.partial(_attn_kernel, heads=heads, out_ch=out_ch,
                             concat=concat, relu=relu, has_edge_alpha=has_ea)
    return pl.pallas_call(
        kern,
        out_shape=jax.ShapeDtypeStruct((n, out_dim), jnp.float32),
        grid=grid,
        in_specs=in_specs,
        out_specs=pl.BlockSpec((tm, out_dim), lambda i: (i, 0)),
        compiler_params=pltpu.CompilerParams(
            dimension_semantics=("parallel",),
            vmem_limit_bytes=_attn_vmem_limit(n, tm, heads, hc, out_dim, has_ea)),
    )(*args)


# ----------------------------------------------------------------------------
# Parameter setup (deterministic, glue code)
# ----------------------------------------------------------------------------
def glorot(key, shape):
    fan_in, fan_out = shape[0], shape[-1]
    lim = (6.0 / (fan_in + fan_out)) ** 0.5
    return jax.random.uniform(key, shape, jnp.float32, -lim, lim)


def blockdiag(att):
    """[H, C] attention vectors -> block-diagonal [H*C, H] projection matrix."""
    h_n, c_n = att.shape
    m = jnp.zeros((h_n * c_n, h_n), jnp.float32)
    for h in range(h_n):
        m = m.at[h * c_n:(h + 1) * c_n, h].set(att[h])
    return m


def init_gat(key, in_ch, out_ch, heads, edge_dim, concat):
    ks = jax.random.split(key, 5)
    p = {
        "w": glorot(ks[0], (in_ch, heads * out_ch)),
        # fused src/dst attention vectors: [H*C, 2H] (src columns first)
        "a_cat": jnp.concatenate([blockdiag(glorot(ks[1], (heads, out_ch))),
                                  blockdiag(glorot(ks[2], (heads, out_ch)))], axis=1),
        "bias": jnp.zeros((heads * out_ch if concat else out_ch,), jnp.float32),
    }
    if edge_dim is not None:
        w_edge = glorot(ks[3], (edge_dim, heads * out_ch))        # lin_edge (no bias)
        att_edge = glorot(ks[4], (heads, out_ch))
        # fold lin_edge followed by per-head att_edge reduction into one [edge_dim, H] matmul
        p["edge_proj"] = w_edge @ blockdiag(att_edge)
    return p


# ----------------------------------------------------------------------------
# Forward pass
# ----------------------------------------------------------------------------
def enhanced_gat_forward(x, src, dst, edge_attr, batch, descriptors, params):
    n = x.shape[0]
    g = descriptors.shape[0]

    # edge_encoder
    edge_emb = linear(edge_attr, params["w_enc"], params["b_enc"])            # [E, 32]

    # add_self_loops (fill_value='mean' of incoming encoded edge features per node)
    loops = jnp.arange(n, dtype=jnp.int32)
    src_full = jnp.concatenate([src, loops])
    dst_full = jnp.concatenate([dst, loops])
    adj = (jnp.zeros((n, n), jnp.float32).at[dst_full, src_full].set(1.0)
           .astype(jnp.bfloat16))
    cnt = jnp.zeros((n,), jnp.float32).at[dst].add(1.0)
    loop_emb = (jnp.zeros((n, edge_emb.shape[1]), jnp.float32).at[dst].add(edge_emb)
                / jnp.maximum(cnt, 1.0)[:, None])
    edge_emb_full = jnp.concatenate([edge_emb, loop_emb], axis=0)             # [E+N, 32]

    # per-edge attention contributions for gat2/gat3/gat4: one fused matmul + one scatter
    edge_proj_cat = jnp.concatenate(
        [params["gat2"]["edge_proj"], params["gat3"]["edge_proj"],
         params["gat4"]["edge_proj"]], axis=1)                                # [32, 9]
    alpha_e = linear(edge_emb_full, edge_proj_cat,
                     jnp.zeros((edge_proj_cat.shape[1],), jnp.float32))       # [E+N, 9]
    dense_all = (jnp.zeros((9, n, n), jnp.float32)
                 .at[:, dst_full, src_full].set(jnp.transpose(alpha_e))
                 .astype(jnp.bfloat16))
    ea2, ea3, ea4 = dense_all[0:4], dense_all[4:8], dense_all[8:9]

    # gat1 (no edge features) + ReLU  -- no zero edge-alpha DMA
    h = gat_layer(x, params["gat1"], adj, None,
                  heads=4, out_ch=HIDDEN, concat=True, relu=True)
    # gat2, gat3 (edge features) + ReLU
    h = gat_layer(h, params["gat2"], adj, ea2,
                  heads=4, out_ch=HIDDEN, concat=True, relu=True)
    h = gat_layer(h, params["gat3"], adj, ea3,
                  heads=4, out_ch=HIDDEN, concat=True, relu=True)
    # gat4 (heads=1, concat=False, no ReLU)
    h = gat_layer(h, params["gat4"], adj, ea4,
                  heads=1, out_ch=HIDDEN, concat=False, relu=False)

    # global_mean_pool as a dense matmul (Pallas linear kernel)
    pool = jnp.zeros((g, n), jnp.float32).at[batch, jnp.arange(n)].set(1.0)
    pool = pool / jnp.sum(pool, axis=1, keepdims=True)
    graph_emb = linear(pool, h, jnp.zeros((h.shape[1],), jnp.float32))        # [G, 32]

    # descriptor_net: Linear + ReLU (+ Dropout = identity in eval)
    desc_emb = linear(descriptors, params["w_desc"], params["b_desc"],
                      activation="relu")                                      # [G, 32]

    combined = jnp.concatenate([graph_emb, desc_emb], axis=1)                 # [G, 64]
    out = linear(combined, params["w_lin"], params["b_lin"],
                 activation="sigmoid")                                        # [G, 1]
    return out.reshape(-1)


# ----------------------------------------------------------------------------
if __name__ == "__main__":
    key = jax.random.PRNGKey(0)
    N, G = 16, 2                       # two graphs of 8 nodes each
    IN_CH, EDGE_CH, DESC_DIM = 8, 4, 48

    # two directed ring graphs (no self-loops; GATConv adds them)
    src_list, dst_list = [], []
    for gi in range(G):
        base = gi * 8
        for i in range(8):
            src_list += [base + i, base + (i + 1) % 8]
            dst_list += [base + (i + 1) % 8, base + i]
    src = jnp.array(src_list, jnp.int32)
    dst = jnp.array(dst_list, jnp.int32)
    E = int(src.shape[0])
    batch = jnp.array([0] * 8 + [1] * 8, jnp.int32)

    keys = jax.random.split(key, 12)
    x = jax.random.normal(keys[0], (N, IN_CH), jnp.float32)
    edge_attr = jax.random.normal(keys[1], (E, EDGE_CH), jnp.float32)
    descriptors = jax.random.normal(keys[2], (G, DESC_DIM), jnp.float32)

    params = {
        "w_enc": glorot(keys[3], (EDGE_CH, HIDDEN)),
        "b_enc": jnp.zeros((HIDDEN,), jnp.float32),
        "gat1": init_gat(keys[4], IN_CH, HIDDEN, 4, None, True),
        "gat2": init_gat(keys[5], 4 * HIDDEN, HIDDEN, 4, HIDDEN, True),
        "gat3": init_gat(keys[6], 4 * HIDDEN, HIDDEN, 4, HIDDEN, True),
        "gat4": init_gat(keys[7], 4 * HIDDEN, HIDDEN, 1, HIDDEN, False),
        "w_desc": glorot(keys[8], (DESC_DIM, HIDDEN)),
        "b_desc": jnp.zeros((HIDDEN,), jnp.float32),
        "w_lin": glorot(keys[9], (2 * HIDDEN, 1)),
        "b_lin": jnp.zeros((1,), jnp.float32),
    }

    fwd = jax.jit(enhanced_gat_forward)
    out = fwd(x, src, dst, edge_attr, batch, descriptors, params)
    out = jax.block_until_ready(out)

    assert out.shape == (G,), out.shape
    assert bool(jnp.all(jnp.isfinite(out)))
    assert bool(jnp.all((out > 0.0) & (out < 1.0)))
    print("KERNEL_OK")
</pallas_src>

<mosaic_0001>
module attributes {stable_mosaic.version = 11 : i64} {
  func.func private @main(%arg0: i32) attributes {dimension_semantics = [#tpu.dimension_semantics<core_parallel>], iteration_bounds = array<i64: 2>, tpu.core_type = #tpu.core_type<sc_scalar_subcore>, window_params = []} {
    return
  }
}

module attributes {stable_mosaic.version = 11 : i64} {
  func.func private @main(%arg0: i32) attributes {dimension_semantics = [#tpu.dimension_semantics<core_parallel>], iteration_bounds = array<i64: 2>, tpu.core_type = #tpu.core_type<sc_scalar_subcore>, window_params = []} {
    return
  }
}

module attributes {stable_mosaic.version = 11 : i64} {
  func.func @_project_kernel(%arg0: i32, %arg1: memref<16x8xbf16, #tpu.memory_space<vmem>>, %arg2: memref<8x128xbf16, #tpu.memory_space<vmem>>, %arg3: memref<128x8xf32, #tpu.memory_space<vmem>>, %arg4: memref<16x128xbf16, #tpu.memory_space<vmem>>, %arg5: memref<4x16xf32, #tpu.memory_space<vmem>>, %arg6: memref<16x4xf32, #tpu.memory_space<vmem>>) attributes {dimension_semantics = [#tpu.dimension_semantics<parallel>], iteration_bounds = array<i64: 1>, scalar_prefetch = 0 : i64, scratch_operands = 0 : i64, tpu.core_type = #tpu.core_type<tc>, window_params = [{transform_indices = @transform_0, window_bounds = array<i64: 16, 8>}, {pipeline_mode = #tpu.pipeline_mode<synchronous>, transform_indices = @transform_1, window_bounds = array<i64: 8, 128>}, {pipeline_mode = #tpu.pipeline_mode<synchronous>, transform_indices = @transform_2, window_bounds = array<i64: 128, 8>}, {transform_indices = @transform_3, window_bounds = array<i64: 16, 128>}, {transform_indices = @transform_4, window_bounds = array<i64: 4, 16>}, {transform_indices = @transform_5, window_bounds = array<i64: 16, 4>}]} {
    %c0 = arith.constant 0 : index
    %c0_0 = arith.constant 0 : index
    %0 = vector.load %arg1[%c0, %c0_0] : memref<16x8xbf16, #tpu.memory_space<vmem>>, vector<16x8xbf16>
    %c0_1 = arith.constant 0 : index
    %c0_2 = arith.constant 0 : index
    %1 = vector.load %arg2[%c0_1, %c0_2] : memref<8x128xbf16, #tpu.memory_space<vmem>>, vector<8x128xbf16>
    %cst = arith.constant dense<0.000000e+00> : vector<16x128xf32>
    %2 = tpu.matmul %0, %1, %cst {dimension_numbers = #tpu.dot_dimension_numbers<[1], [0], [0], [1], [0, 0, 1, 1], [], []>} : vector<16x8xbf16>, vector<8x128xbf16>, vector<16x128xf32> -> vector<16x128xf32>
    %c0_3 = arith.constant 0 : index
    %c0_4 = arith.constant 0 : index
    %3 = vector.load %arg3[%c0_3, %c0_4] : memref<128x8xf32, #tpu.memory_space<vmem>>, vector<128x8xf32>
    %cst_5 = arith.constant dense<0.000000e+00> : vector<16x8xf32>
    %4 = tpu.matmul %2, %3, %cst_5 {dimension_numbers = #tpu.dot_dimension_numbers<[1], [0], [0], [1], [0, 0, 1, 1], [], []>} : vector<16x128xf32>, vector<128x8xf32>, vector<16x8xf32> -> vector<16x8xf32>
    %5 = arith.truncf %2 : vector<16x128xf32> to vector<16x128xbf16>
    %c0_6 = arith.constant 0 : index
    %c0_7 = arith.constant 0 : index
    %6 = vector.load %arg4[%c0_6, %c0_7] : memref<16x128xbf16, #tpu.memory_space<vmem>>, vector<16x128xbf16>
    tpu.vector_store %arg4[%c0_6, %c0_7], %5 {strides = array<i32>} : memref<16x128xbf16, #tpu.memory_space<vmem>>, vector<16x128xbf16>,
    %7 = vector.extract_strided_slice %4 {offsets = [0, 0], sizes = [16, 4], strides = [1, 1]} : vector<16x8xf32> to vector<16x4xf32>
    %8 = tpu.transpose %7, [1, 0] : vector<16x4xf32> -> vector<4x16xf32>
    %c0_8 = arith.constant 0 : index
    %c0_9 = arith.constant 0 : index
    %9 = vector.load %arg5[%c0_8, %c0_9] : memref<4x16xf32, #tpu.memory_space<vmem>>, vector<4x16xf32>
    tpu.vector_store %arg5[%c0_8, %c0_9], %8 {strides = array<i32>} : memref<4x16xf32, #tpu.memory_space<vmem>>, vector<4x16xf32>,
    %10 = vector.extract_strided_slice %4 {offsets = [0, 4], sizes = [16, 4], strides = [1, 1]} : vector<16x8xf32> to vector<16x4xf32>
    %c0_10 = arith.constant 0 : index
    %c0_11 = arith.constant 0 : index
    %11 = vector.load %arg6[%c0_10, %c0_11] : memref<16x4xf32, #tpu.memory_space<vmem>>, vector<16x4xf32>
    tpu.vector_store %arg6[%c0_10, %c0_11], %10 {strides = array<i32>} : memref<16x4xf32, #tpu.memory_space<vmem>>, vector<16x4xf32>,
    return
  }
  func.func @transform_0(%arg0: i32) -> (i32, i32) {
    %c0_i32 = arith.constant 0 : i32
    %c0_i32_0 = arith.constant 0 : i32
    return %arg0, %c0_i32 : i32, i32
  }
  func.func @transform_1(%arg0: i32) -> (i32, i32) {
    %c0_i32 = arith.constant 0 : i32
    %c0_i32_0 = arith.constant 0 : i32
    %c0_i32_1 = arith.constant 0 : i32
    return %c0_i32, %c0_i32_0 : i32, i32
  }
  func.func @transform_2(%arg0: i32) -> (i32, i32) {
    %c0_i32 = arith.constant 0 : i32
    %c0_i32_0 = arith.constant 0 : i32
    %c0_i32_1 = arith.constant 0 : i32
    return %c0_i32, %c0_i32_0 : i32, i32
  }
  func.func @transform_3(%arg0: i32) -> (i32, i32) {
    %c0_i32 = arith.constant 0 : i32
    %c0_i32_0 = arith.constant 0 : i32
    return %arg0, %c0_i32 : i32, i32
  }
  func.func @transform_4(%arg0: i32) -> (i32, i32) {
    %c0_i32 = arith.constant 0 : i32
    %c0_i32_0 = arith.constant 0 : i32
    return %c0_i32, %arg0 : i32, i32
  }
  func.func @transform_5(%arg0: i32) -> (i32, i32) {
    %c0_i32 = arith.constant 0 : i32
    %c0_i32_0 = arith.constant 0 : i32
    return %arg0, %c0_i32 : i32, i32
  }
}

module attributes {stable_mosaic.version = 11 : i64} {
  func.func @_attn_kernel(%arg0: i32, %arg1: memref<16x4xf32, #tpu.memory_space<vmem>>, %arg2: memref<4x16xf32, #tpu.memory_space<vmem>>, %arg3: memref<16x128xbf16, #tpu.memory_space<vmem>>, %arg4: memref<16x16xbf16, #tpu.memory_space<vmem>>, %arg5: memref<1x128xf32, #tpu.memory_space<vmem>>, %arg6: memref<16x128xf32, #tpu.memory_space<vmem>>) attributes {dimension_semantics = [#tpu.dimension_semantics<parallel>], iteration_bounds = array<i64: 1>, scalar_prefetch = 0 : i64, scratch_operands = 0 : i64, tpu.core_type = #tpu.core_type<tc>, window_params = [{transform_indices = @transform_0, window_bounds = array<i64: 16, 4>}, {pipeline_mode = #tpu.pipeline_mode<synchronous>, transform_indices = @transform_1, window_bounds = array<i64: 4, 16>}, {pipeline_mode = #tpu.pipeline_mode<synchronous>, transform_indices = @transform_2, window_bounds = array<i64: 16, 128>}, {transform_indices = @transform_3, window_bounds = array<i64: 16, 16>}, {pipeline_mode = #tpu.pipeline_mode<synchronous>, transform_indices = @transform_4, window_bounds = array<i64: 1, 128>}, {transform_indices = @transform_5, window_bounds = array<i64: 16, 128>}]} {
    %c0 = arith.constant 0 : index
    %c0_0 = arith.constant 0 : index
    %0 = vector.load %arg1[%c0, %c0_0] : memref<16x4xf32, #tpu.memory_space<vmem>>, vector<16x4xf32>
    %c0_1 = arith.constant 0 : index
    %c0_2 = arith.constant 0 : index
    %1 = vector.load %arg2[%c0_1, %c0_2] : memref<4x16xf32, #tpu.memory_space<vmem>>, vector<4x16xf32>
    %c0_3 = arith.constant 0 : index
    %c0_4 = arith.constant 0 : index
    %2 = vector.load %arg3[%c0_3, %c0_4] : memref<16x128xbf16, #tpu.memory_space<vmem>>, vector<16x128xbf16>
    %c0_5 = arith.constant 0 : index
    %c0_6 = arith.constant 0 : index
    %3 = vector.load %arg4[%c0_5, %c0_6] : memref<16x16xbf16, #tpu.memory_space<vmem>>, vector<16x16xbf16>
    %cst = arith.constant 0.000000e+00 : bf16
    %4 = vector.broadcast %cst : bf16 to vector<16x16xbf16>
    %5 = arith.cmpf ogt, %3, %4 : vector<16x16xbf16>
    %6 = vector.extract_strided_slice %0 {offsets = [0, 0], sizes = [16, 1], strides = [1, 1]} : vector<16x4xf32> to vector<16x1xf32>
    %7 = vector.extract_strided_slice %1 {offsets = [0, 0], sizes = [1, 16], strides = [1, 1]} : vector<4x16xf32> to vector<1x16xf32>
    %8 = vector.broadcast %6 : vector<16x1xf32> to vector<16x16xf32>
    %9 = vector.broadcast %7 : vector<1x16xf32> to vector<16x16xf32>
    %10 = arith.addf %8, %9 : vector<16x16xf32>
    %cst_7 = arith.constant 0.000000e+00 : f32
    %11 = vector.broadcast %cst_7 : f32 to vector<16x16xf32>
    %12 = arith.cmpf ogt, %10, %11 : vector<16x16xf32>
    %cst_8 = arith.constant 2.000000e-01 : f32
    %13 = vector.broadcast %cst_8 : f32 to vector<16x16xf32>
    %14 = arith.mulf %13, %10 : vector<16x16xf32>
    %15 = arith.select %12, %10, %14 : vector<16x16xi1>, vector<16x16xf32>
    %cst_9 = arith.constant -1.000000e+30 : f32
    %16 = vector.broadcast %cst_9 : f32 to vector<16x16xf32>
    %17 = arith.select %5, %15, %16 : vector<16x16xi1>, vector<16x16xf32>
    %cst_10 = arith.constant dense<0xFF800000> : vector<16xf32>
    %18 = vector.multi_reduction <maximumf>, %17, %cst_10 [1] : vector<16x16xf32> to vector<16xf32>
    %19 = vector.shape_cast %18 : vector<16xf32> to vector<16x1xf32>
    %20 = vector.broadcast %19 : vector<16x1xf32> to vector<16x16xf32>
    %21 = arith.subf %17, %20 : vector<16x16xf32>
    %22 = math.exp %21 : vector<16x16xf32>
    %cst_11 = arith.constant dense<0.000000e+00> : vector<16xf32>
    %23 = vector.multi_reduction <add>, %22, %cst_11 [1] : vector<16x16xf32> to vector<16xf32>
    %24 = vector.shape_cast %23 : vector<16xf32> to vector<16x1xf32>
    %25 = arith.truncf %22 : vector<16x16xf32> to vector<16x16xbf16>
    %26 = vector.extract_strided_slice %2 {offsets = [0, 0], sizes = [16, 32], strides = [1, 1]} : vector<16x128xbf16> to vector<16x32xbf16>
    %cst_12 = arith.constant dense<0.000000e+00> : vector<16x32xf32>
    %27 = tpu.matmul %25, %26, %cst_12 {dimension_numbers = #tpu.dot_dimension_numbers<[1], [0], [0], [1], [0, 0, 1, 1], [], []>} : vector<16x16xbf16>, vector<16x32xbf16>, vector<16x32xf32> -> vector<16x32xf32>
    %28 = tpu.reciprocal %24 {approx = true} : vector<16x1xf32> -> vector<16x1xf32>
    %29 = vector.broadcast %28 : vector<16x1xf32> to vector<16x32xf32>
    %30 = arith.mulf %27, %29 : vector<16x32xf32>
    %31 = vector.extract_strided_slice %0 {offsets = [0, 1], sizes = [16, 1], strides = [1, 1]} : vector<16x4xf32> to vector<16x1xf32>
    %32 = vector.extract_strided_slice %1 {offsets = [1, 0], sizes = [1, 16], strides = [1, 1]} : vector<4x16xf32> to vector<1x16xf32>
    %33 = vector.broadcast %31 : vector<16x1xf32> to vector<16x16xf32>
    %34 = vector.broadcast %32 : vector<1x16xf32> to vector<16x16xf32>
    %35 = arith.addf %33, %34 : vector<16x16xf32>
    %cst_13 = arith.constant 0.000000e+00 : f32
    %36 = vector.broadcast %cst_13 : f32 to vector<16x16xf32>
    %37 = arith.cmpf ogt, %35, %36 : vector<16x16xf32>
    %cst_14 = arith.constant 2.000000e-01 : f32
    %38 = vector.broadcast %cst_14 : f32 to vector<16x16xf32>
    %39 = arith.mulf %38, %35 : vector<16x16xf32>
    %40 = arith.select %37, %35, %39 : vector<16x16xi1>, vector<16x16xf32>
    %cst_15 = arith.constant -1.000000e+30 : f32
    %41 = vector.broadcast %cst_15 : f32 to vector<16x16xf32>
    %42 = arith.select %5, %40, %41 : vector<16x16xi1>, vector<16x16xf32>
    %cst_16 = arith.constant dense<0xFF800000> : vector<16xf32>
    %43 = vector.multi_reduction <maximumf>, %42, %cst_16 [1] : vector<16x16xf32> to vector<16xf32>
    %44 = vector.shape_cast %43 : vector<16xf32> to vector<16x1xf32>
    %45 = vector.broadcast %44 : vector<16x1xf32> to vector<16x16xf32>
    %46 = arith.subf %42, %45 : vector<16x16xf32>
    %47 = math.exp %46 : vector<16x16xf32>
    %cst_17 = arith.constant dense<0.000000e+00> : vector<16xf32>
    %48 = vector.multi_reduction <add>, %47, %cst_17 [1] : vector<16x16xf32> to vector<16xf32>
    %49 = vector.shape_cast %48 : vector<16xf32> to vector<16x1xf32>
    %50 = arith.truncf %47 : vector<16x16xf32> to vector<16x16xbf16>
    %51 = vector.extract_strided_slice %2 {offsets = [0, 32], sizes = [16, 32], strides = [1, 1]} : vector<16x128xbf16> to vector<16x32xbf16>
    %cst_18 = arith.constant dense<0.000000e+00> : vector<16x32xf32>
    %52 = tpu.matmul %50, %51, %cst_18 {dimension_numbers = #tpu.dot_dimension_numbers<[1], [0], [0], [1], [0, 0, 1, 1], [], []>} : vector<16x16xbf16>, vector<16x32xbf16>, vector<16x32xf32> -> vector<16x32xf32>
    %53 = tpu.reciprocal %49 {approx = true} : vector<16x1xf32> -> vector<16x1xf32>
    %54 = vector.broadcast %53 : vector<16x1xf32> to vector<16x32xf32>
    %55 = arith.mulf %52, %54 : vector<16x32xf32>
    %56 = vector.extract_strided_slice %0 {offsets = [0, 2], sizes = [16, 1], strides = [1, 1]} : vector<16x4xf32> to vector<16x1xf32>
    %57 = vector.extract_strided_slice %1 {offsets = [2, 0], sizes = [1, 16], strides = [1, 1]} : vector<4x16xf32> to vector<1x16xf32>
    %58 = vector.broadcast %56 : vector<16x1xf32> to vector<16x16xf32>
    %59 = vector.broadcast %57 : vector<1x16xf32> to vector<16x16xf32>
    %60 = arith.addf %58, %59 : vector<16x16xf32>
    %cst_19 = arith.constant 0.000000e+00 : f32
    %61 = vector.broadcast %cst_19 : f32 to vector<16x16xf32>
    %62 = arith.cmpf ogt, %60, %61 : vector<16x16xf32>
    %cst_20 = arith.constant 2.000000e-01 : f32
    %63 = vector.broadcast %cst_20 : f32 to vector<16x16xf32>
    %64 = arith.mulf %63, %60 : vector<16x16xf32>
    %65 = arith.select %62, %60, %64 : vector<16x16xi1>, vector<16x16xf32>
    %cst_21 = arith.constant -1.000000e+30 : f32
    %66 = vector.broadcast %cst_21 : f32 to vector<16x16xf32>
    %67 = arith.select %5, %65, %66 : vector<16x16xi1>, vector<16x16xf32>
    %cst_22 = arith.constant dense<0xFF800000> : vector<16xf32>
    %68 = vector.multi_reduction <maximumf>, %67, %cst_22 [1] : vector<16x16xf32> to vector<16xf32>
    %69 = vector.shape_cast %68 : vector<16xf32> to vector<16x1xf32>
    %70 = vector.broadcast %69 : vector<16x1xf32> to vector<16x16xf32>
    %71 = arith.subf %67, %70 : vector<16x16xf32>
    %72 = math.exp %71 : vector<16x16xf32>
    %cst_23 = arith.constant dense<0.000000e+00> : vector<16xf32>
    %73 = vector.multi_reduction <add>, %72, %cst_23 [1] : vector<16x16xf32> to vector<16xf32>
    %74 = vector.shape_cast %73 : vector<16xf32> to vector<16x1xf32>
    %75 = arith.truncf %72 : vector<16x16xf32> to vector<16x16xbf16>
    %76 = vector.extract_strided_slice %2 {offsets = [0, 64], sizes = [16, 32], strides = [1, 1]} : vector<16x128xbf16> to vector<16x32xbf16>
    %cst_24 = arith.constant dense<0.000000e+00> : vector<16x32xf32>
    %77 = tpu.matmul %75, %76, %cst_24 {dimension_numbers = #tpu.dot_dimension_numbers<[1], [0], [0], [1], [0, 0, 1, 1], [], []>} : vector<16x16xbf16>, vector<16x32xbf16>, vector<16x32xf32> -> vector<16x32xf32>
    %78 = tpu.reciprocal %74 {approx = true} : vector<16x1xf32> -> vector<16x1xf32>
    %79 = vector.broadcast %78 : vector<16x1xf32> to vector<16x32xf32>
    %80 = arith.mulf %77, %79 : vector<16x32xf32>
    %81 = vector.extract_strided_slice %0 {offsets = [0, 3], sizes = [16, 1], strides = [1, 1]} : vector<16x4xf32> to vector<16x1xf32>
    %82 = vector.extract_strided_slice %1 {offsets = [3, 0], sizes = [1, 16], strides = [1, 1]} : vector<4x16xf32> to vector<1x16xf32>
    %83 = vector.broadcast %81 : vector<16x1xf32> to vector<16x16xf32>
    %84 = vector.broadcast %82 : vector<1x16xf32> to vector<16x16xf32>
    %85 = arith.addf %83, %84 : vector<16x16xf32>
    %cst_25 = arith.constant 0.000000e+00 : f32
    %86 = vector.broadcast %cst_25 : f32 to vector<16x16xf32>
    %87 = arith.cmpf ogt, %85, %86 : vector<16x16xf32>
    %cst_26 = arith.constant 2.000000e-01 : f32
    %88 = vector.broadcast %cst_26 : f32 to vector<16x16xf32>
    %89 = arith.mulf %88, %85 : vector<16x16xf32>
    %90 = arith.select %87, %85, %89 : vector<16x16xi1>, vector<16x16xf32>
    %cst_27 = arith.constant -1.000000e+30 : f32
    %91 = vector.broadcast %cst_27 : f32 to vector<16x16xf32>
    %92 = arith.select %5, %90, %91 : vector<16x16xi1>, vector<16x16xf32>
    %cst_28 = arith.constant dense<0xFF800000> : vector<16xf32>
    %93 = vector.multi_reduction <maximumf>, %92, %cst_28 [1] : vector<16x16xf32> to vector<16xf32>
    %94 = vector.shape_cast %93 : vector<16xf32> to vector<16x1xf32>
    %95 = vector.broadcast %94 : vector<16x1xf32> to vector<16x16xf32>
    %96 = arith.subf %92, %95 : vector<16x16xf32>
    %97 = math.exp %96 : vector<16x16xf32>
    %cst_29 = arith.constant dense<0.000000e+00> : vector<16xf32>
    %98 = vector.multi_reduction <add>, %97, %cst_29 [1] : vector<16x16xf32> to vector<16xf32>
    %99 = vector.shape_cast %98 : vector<16xf32> to vector<16x1xf32>
    %100 = arith.truncf %97 : vector<16x16xf32> to vector<16x16xbf16>
    %101 = vector.extract_strided_slice %2 {offsets = [0, 96], sizes = [16, 32], strides = [1, 1]} : vector<16x128xbf16> to vector<16x32xbf16>
    %cst_30 = arith.constant dense<0.000000e+00> : vector<16x32xf32>
    %102 = tpu.matmul %100, %101, %cst_30 {dimension_numbers = #tpu.dot_dimension_numbers<[1], [0], [0], [1], [0, 0, 1, 1], [], []>} : vector<16x16xbf16>, vector<16x32xbf16>, vector<16x32xf32> -> vector<16x32xf32>
    %103 = tpu.reciprocal %99 {approx = true} : vector<16x1xf32> -> vector<16x1xf32>
    %104 = vector.broadcast %103 : vector<16x1xf32> to vector<16x32xf32>
    %105 = arith.mulf %102, %104 : vector<16x32xf32>
    %106 = tpu.concatenate %30, %55, %80, %105 in 1 : vector<16x32xf32>, vector<16x32xf32>, vector<16x32xf32>, vector<16x32xf32> -> vector<16x128xf32>
    %c0_31 = arith.constant 0 : index
    %c0_32 = arith.constant 0 : index
    %107 = vector.load %arg5[%c0_31, %c0_32] : memref<1x128xf32, #tpu.memory_space<vmem>>, vector<1x128xf32>
    %108 = vector.broadcast %107 : vector<1x128xf32> to vector<16x128xf32>
    %109 = arith.addf %106, %108 : vector<16x128xf32>
    %cst_33 = arith.constant 0.000000e+00 : f32
    %110 = vector.broadcast %cst_33 : f32 to vector<16x128xf32>
    %111 = arith.maximumf %109, %110 : vector<16x128xf32>
    %c0_34 = arith.constant 0 : index
    %c0_35 = arith.constant 0 : index
    %112 = vector.load %arg6[%c0_34, %c0_35] : memref<16x128xf32, #tpu.memory_space<vmem>>, vector<16x128xf32>
    tpu.vector_store %arg6[%c0_34, %c0_35], %111 {strides = array<i32>} : memref<16x128xf32, #tpu.memory_space<vmem>>, vector<16x128xf32>,
    return
  }
  func.func @transform_0(%arg0: i32) -> (i32, i32) {
    %c0_i32 = arith.constant 0 : i32
    %c0_i32_0 = arith.constant 0 : i32
    return %arg0, %c0_i32 : i32, i32
  }
  func.func @transform_1(%arg0: i32) -> (i32, i32) {
    %c0_i32 = arith.constant 0 : i32
    %c0_i32_0 = arith.constant 0 : i32
    %c0_i32_1 = arith.constant 0 : i32
    return %c0_i32, %c0_i32_0 : i32, i32
  }
  func.func @transform_2(%arg0: i32) -> (i32, i32) {
    %c0_i32 = arith.constant 0 : i32
    %c0_i32_0 = arith.constant 0 : i32
    %c0_i32_1 = arith.constant 0 : i32
    return %c0_i32, %c0_i32_0 : i32, i32
  }
  func.func @transform_3(%arg0: i32) -> (i32, i32) {
    %c0_i32 = arith.constant 0 : i32
    %c0_i32_0 = arith.constant 0 : i32
    return %arg0, %c0_i32 : i32, i32
  }
  func.func @transform_4(%arg0: i32) -> (i32, i32) {
    %c0_i32 = arith.constant 0 : i32
    %c0_i32_0 = arith.constant 0 : i32
    %c0_i32_1 = arith.constant 0 : i32
    return %c0_i32, %c0_i32_0 : i32, i32
  }
  func.func @transform_5(%arg0: i32) -> (i32, i32) {
    %c0_i32 = arith.constant 0 : i32
    %c0_i32_0 = arith.constant 0 : i32
    return %arg0, %c0_i32 : i32, i32
  }
}

module attributes {stable_mosaic.version = 11 : i64} {
  func.func @_linear_kernel(%arg0: memref<32x4xf32, #tpu.memory_space<vmem>>, %arg1: memref<4x32xf32, #tpu.memory_space<vmem>>, %arg2: memref<1x32xf32, #tpu.memory_space<vmem>>, %arg3: memref<32x32xf32, #tpu.memory_space<vmem>>) attributes {dimension_semantics = [], scalar_prefetch = 0 : i64, scratch_operands = 0 : i64, tpu.core_type = #tpu.core_type<tc>} {
    %c0 = arith.constant 0 : index
    %c0_0 = arith.constant 0 : index
    %0 = vector.load %arg0[%c0, %c0_0] : memref<32x4xf32, #tpu.memory_space<vmem>>, vector<32x4xf32>
    %1 = arith.truncf %0 : vector<32x4xf32> to vector<32x4xbf16>
    %c0_1 = arith.constant 0 : index
    %c0_2 = arith.constant 0 : index
    %2 = vector.load %arg1[%c0_1, %c0_2] : memref<4x32xf32, #tpu.memory_space<vmem>>, vector<4x32xf32>
    %3 = arith.truncf %2 : vector<4x32xf32> to vector<4x32xbf16>
    %cst = arith.constant dense<0.000000e+00> : vector<32x32xf32>
    %4 = tpu.matmul %1, %3, %cst {dimension_numbers = #tpu.dot_dimension_numbers<[1], [0], [0], [1], [0, 0, 1, 1], [], []>} : vector<32x4xbf16>, vector<4x32xbf16>, vector<32x32xf32> -> vector<32x32xf32>
    %c0_3 = arith.constant 0 : index
    %c0_4 = arith.constant 0 : index
    %5 = vector.load %arg2[%c0_3, %c0_4] : memref<1x32xf32, #tpu.memory_space<vmem>>, vector<1x32xf32>
    %6 = vector.broadcast %5 : vector<1x32xf32> to vector<32x32xf32>
    %7 = arith.addf %4, %6 : vector<32x32xf32>
    %c0_5 = arith.constant 0 : index
    %c0_6 = arith.constant 0 : index
    %8 = vector.load %arg3[%c0_5, %c0_6] : memref<32x32xf32, #tpu.memory_space<vmem>>, vector<32x32xf32>
    tpu.vector_store %arg3[%c0_5, %c0_6], %7 {strides = array<i32>} : memref<32x32xf32, #tpu.memory_space<vmem>>, vector<32x32xf32>,
    return
  }
}

module attributes {stable_mosaic.version = 11 : i64} {
  func.func @_linear_kernel(%arg0: memref<2x48xf32, #tpu.memory_space<vmem>>, %arg1: memref<48x32xf32, #tpu.memory_space<vmem>>, %arg2: memref<1x32xf32, #tpu.memory_space<vmem>>, %arg3: memref<2x32xf32, #tpu.memory_space<vmem>>) attributes {dimension_semantics = [], scalar_prefetch = 0 : i64, scratch_operands = 0 : i64, tpu.core_type = #tpu.core_type<tc>} {
    %c0 = arith.constant 0 : index
    %c0_0 = arith.constant 0 : index
    %0 = vector.load %arg0[%c0, %c0_0] : memref<2x48xf32, #tpu.memory_space<vmem>>, vector<2x48xf32>
    %1 = arith.truncf %0 : vector<2x48xf32> to vector<2x48xbf16>
    %c0_1 = arith.constant 0 : index
    %c0_2 = arith.constant 0 : index
    %2 = vector.load %arg1[%c0_1, %c0_2] : memref<48x32xf32, #tpu.memory_space<vmem>>, vector<48x32xf32>
    %3 = arith.truncf %2 : vector<48x32xf32> to vector<48x32xbf16>
    %cst = arith.constant dense<0.000000e+00> : vector<2x32xf32>
    %4 = tpu.matmul %1, %3, %cst {dimension_numbers = #tpu.dot_dimension_numbers<[1], [0], [0], [1], [0, 0, 1, 1], [], []>} : vector<2x48xbf16>, vector<48x32xbf16>, vector<2x32xf32> -> vector<2x32xf32>
    %c0_3 = arith.constant 0 : index
    %c0_4 = arith.constant 0 : index
    %5 = vector.load %arg2[%c0_3, %c0_4] : memref<1x32xf32, #tpu.memory_space<vmem>>, vector<1x32xf32>
    %6 = vector.broadcast %5 : vector<1x32xf32> to vector<2x32xf32>
    %7 = arith.addf %4, %6 : vector<2x32xf32>
    %cst_5 = arith.constant 0.000000e+00 : f32
    %8 = vector.broadcast %cst_5 : f32 to vector<2x32xf32>
    %9 = arith.maximumf %7, %8 : vector<2x32xf32>
    %c0_6 = arith.constant 0 : index
    %c0_7 = arith.constant 0 : index
    %10 = vector.load %arg3[%c0_6, %c0_7] : memref<2x32xf32, #tpu.memory_space<vmem>>, vector<2x32xf32>
    tpu.vector_store %arg3[%c0_6, %c0_7], %9 {strides = array<i32>} : memref<2x32xf32, #tpu.memory_space<vmem>>, vector<2x32xf32>,
    return
  }
}

module attributes {stable_mosaic.version = 11 : i64} {
  func.func @_project_kernel(%arg0: i32, %arg1: memref<16x128xbf16, #tpu.memory_space<vmem>>, %arg2: memref<128x128xbf16, #tpu.memory_space<vmem>>, %arg3: memref<128x8xf32, #tpu.memory_space<vmem>>, %arg4: memref<16x128xbf16, #tpu.memory_space<vmem>>, %arg5: memref<4x16xf32, #tpu.memory_space<vmem>>, %arg6: memref<16x4xf32, #tpu.memory_space<vmem>>) attributes {dimension_semantics = [#tpu.dimension_semantics<parallel>], iteration_bounds = array<i64: 1>, scalar_prefetch = 0 : i64, scratch_operands = 0 : i64, tpu.core_type = #tpu.core_type<tc>, window_params = [{transform_indices = @transform_0, window_bounds = array<i64: 16, 128>}, {pipeline_mode = #tpu.pipeline_mode<synchronous>, transform_indices = @transform_1, window_bounds = array<i64: 128, 128>}, {pipeline_mode = #tpu.pipeline_mode<synchronous>, transform_indices = @transform_2, window_bounds = array<i64: 128, 8>}, {transform_indices = @transform_3, window_bounds = array<i64: 16, 128>}, {transform_indices = @transform_4, window_bounds = array<i64: 4, 16>}, {transform_indices = @transform_5, window_bounds = array<i64: 16, 4>}]} {
    %c0 = arith.constant 0 : index
    %c0_0 = arith.constant 0 : index
    %0 = vector.load %arg1[%c0, %c0_0] : memref<16x128xbf16, #tpu.memory_space<vmem>>, vector<16x128xbf16>
    %c0_1 = arith.constant 0 : index
    %c0_2 = arith.constant 0 : index
    %1 = vector.load %arg2[%c0_1, %c0_2] : memref<128x128xbf16, #tpu.memory_space<vmem>>, vector<128x128xbf16>
    %cst = arith.constant dense<0.000000e+00> : vector<16x128xf32>
    %2 = tpu.matmul %0, %1, %cst {dimension_numbers = #tpu.dot_dimension_numbers<[1], [0], [0], [1], [0, 0, 1, 1], [], []>} : vector<16x128xbf16>, vector<128x128xbf16>, vector<16x128xf32> -> vector<16x128xf32>
    %c0_3 = arith.constant 0 : index
    %c0_4 = arith.constant 0 : index
    %3 = vector.load %arg3[%c0_3, %c0_4] : memref<128x8xf32, #tpu.memory_space<vmem>>, vector<128x8xf32>
    %cst_5 = arith.constant dense<0.000000e+00> : vector<16x8xf32>
    %4 = tpu.matmul %2, %3, %cst_5 {dimension_numbers = #tpu.dot_dimension_numbers<[1], [0], [0], [1], [0, 0, 1, 1], [], []>} : vector<16x128xf32>, vector<128x8xf32>, vector<16x8xf32> -> vector<16x8xf32>
    %5 = arith.truncf %2 : vector<16x128xf32> to vector<16x128xbf16>
    %c0_6 = arith.constant 0 : index
    %c0_7 = arith.constant 0 : index
    %6 = vector.load %arg4[%c0_6, %c0_7] : memref<16x128xbf16, #tpu.memory_space<vmem>>, vector<16x128xbf16>
    tpu.vector_store %arg4[%c0_6, %c0_7], %5 {strides = array<i32>} : memref<16x128xbf16, #tpu.memory_space<vmem>>, vector<16x128xbf16>,
    %7 = vector.extract_strided_slice %4 {offsets = [0, 0], sizes = [16, 4], strides = [1, 1]} : vector<16x8xf32> to vector<16x4xf32>
    %8 = tpu.transpose %7, [1, 0] : vector<16x4xf32> -> vector<4x16xf32>
    %c0_8 = arith.constant 0 : index
    %c0_9 = arith.constant 0 : index
    %9 = vector.load %arg5[%c0_8, %c0_9] : memref<4x16xf32, #tpu.memory_space<vmem>>, vector<4x16xf32>
    tpu.vector_store %arg5[%c0_8, %c0_9], %8 {strides = array<i32>} : memref<4x16xf32, #tpu.memory_space<vmem>>, vector<4x16xf32>,
    %10 = vector.extract_strided_slice %4 {offsets = [0, 4], sizes = [16, 4], strides = [1, 1]} : vector<16x8xf32> to vector<16x4xf32>
    %c0_10 = arith.constant 0 : index
    %c0_11 = arith.constant 0 : index
    %11 = vector.load %arg6[%c0_10, %c0_11] : memref<16x4xf32, #tpu.memory_space<vmem>>, vector<16x4xf32>
    tpu.vector_store %arg6[%c0_10, %c0_11], %10 {strides = array<i32>} : memref<16x4xf32, #tpu.memory_space<vmem>>, vector<16x4xf32>,
    return
  }
  func.func @transform_0(%arg0: i32) -> (i32, i32) {
    %c0_i32 = arith.constant 0 : i32
    %c0_i32_0 = arith.constant 0 : i32
    return %arg0, %c0_i32 : i32, i32
  }
  func.func @transform_1(%arg0: i32) -> (i32, i32) {
    %c0_i32 = arith.constant 0 : i32
    %c0_i32_0 = arith.constant 0 : i32
    %c0_i32_1 = arith.constant 0 : i32
    return %c0_i32, %c0_i32_0 : i32, i32
  }
  func.func @transform_2(%arg0: i32) -> (i32, i32) {
    %c0_i32 = arith.constant 0 : i32
    %c0_i32_0 = arith.constant 0 : i32
    %c0_i32_1 = arith.constant 0 : i32
    return %c0_i32, %c0_i32_0 : i32, i32
  }
  func.func @transform_3(%arg0: i32) -> (i32, i32) {
    %c0_i32 = arith.constant 0 : i32
    %c0_i32_0 = arith.constant 0 : i32
    return %arg0, %c0_i32 : i32, i32
  }
  func.func @transform_4(%arg0: i32) -> (i32, i32) {
    %c0_i32 = arith.constant 0 : i32
    %c0_i32_0 = arith.constant 0 : i32
    return %c0_i32, %arg0 : i32, i32
  }
  func.func @transform_5(%arg0: i32) -> (i32, i32) {
    %c0_i32 = arith.constant 0 : i32
    %c0_i32_0 = arith.constant 0 : i32
    return %arg0, %c0_i32 : i32, i32
  }
}

module attributes {stable_mosaic.version = 11 : i64} {
  func.func @_linear_kernel(%arg0: memref<48x32xf32, #tpu.memory_space<vmem>>, %arg1: memref<32x9xf32, #tpu.memory_space<vmem>>, %arg2: memref<1x9xf32, #tpu.memory_space<vmem>>, %arg3: memref<48x9xf32, #tpu.memory_space<vmem>>) attributes {dimension_semantics = [], scalar_prefetch = 0 : i64, scratch_operands = 0 : i64, tpu.core_type = #tpu.core_type<tc>} {
    %c0 = arith.constant 0 : index
    %c0_0 = arith.constant 0 : index
    %0 = vector.load %arg0[%c0, %c0_0] : memref<48x32xf32, #tpu.memory_space<vmem>>, vector<48x32xf32>
    %1 = arith.truncf %0 : vector<48x32xf32> to vector<48x32xbf16>
    %c0_1 = arith.constant 0 : index
    %c0_2 = arith.constant 0 : index
    %2 = vector.load %arg1[%c0_1, %c0_2] : memref<32x9xf32, #tpu.memory_space<vmem>>, vector<32x9xf32>
    %3 = arith.truncf %2 : vector<32x9xf32> to vector<32x9xbf16>
    %cst = arith.constant dense<0.000000e+00> : vector<48x9xf32>
    %4 = tpu.matmul %1, %3, %cst {dimension_numbers = #tpu.dot_dimension_numbers<[1], [0], [0], [1], [0, 0, 1, 1], [], []>} : vector<48x32xbf16>, vector<32x9xbf16>, vector<48x9xf32> -> vector<48x9xf32>
    %c0_3 = arith.constant 0 : index
    %c0_4 = arith.constant 0 : index
    %5 = vector.load %arg2[%c0_3, %c0_4] : memref<1x9xf32, #tpu.memory_space<vmem>>, vector<1x9xf32>
    %6 = vector.broadcast %5 : vector<1x9xf32> to vector<48x9xf32>
    %7 = arith.addf %4, %6 : vector<48x9xf32>
    %c0_5 = arith.constant 0 : index
    %c0_6 = arith.constant 0 : index
    %8 = vector.load %arg3[%c0_5, %c0_6] : memref<48x9xf32, #tpu.memory_space<vmem>>, vector<48x9xf32>
    tpu.vector_store %arg3[%c0_5, %c0_6], %7 {strides = array<i32>} : memref<48x9xf32, #tpu.memory_space<vmem>>, vector<48x9xf32>,
    return
  }
}

module attributes {stable_mosaic.version = 11 : i64} {
  func.func @_project_kernel(%arg0: i32, %arg1: memref<16x128xbf16, #tpu.memory_space<vmem>>, %arg2: memref<128x32xbf16, #tpu.memory_space<vmem>>, %arg3: memref<32x2xf32, #tpu.memory_space<vmem>>, %arg4: memref<16x32xbf16, #tpu.memory_space<vmem>>, %arg5: memref<1x16xf32, #tpu.memory_space<vmem>>, %arg6: memref<16x1xf32, #tpu.memory_space<vmem>>) attributes {dimension_semantics = [#tpu.dimension_semantics<parallel>], iteration_bounds = array<i64: 1>, scalar_prefetch = 0 : i64, scratch_operands = 0 : i64, tpu.core_type = #tpu.core_type<tc>, window_params = [{transform_indices = @transform_0, window_bounds = array<i64: 16, 128>}, {pipeline_mode = #tpu.pipeline_mode<synchronous>, transform_indices = @transform_1, window_bounds = array<i64: 128, 32>}, {pipeline_mode = #tpu.pipeline_mode<synchronous>, transform_indices = @transform_2, window_bounds = array<i64: 32, 2>}, {transform_indices = @transform_3, window_bounds = array<i64: 16, 32>}, {transform_indices = @transform_4, window_bounds = array<i64: 1, 16>}, {transform_indices = @transform_5, window_bounds = array<i64: 16, 1>}]} {
    %c0 = arith.constant 0 : index
    %c0_0 = arith.constant 0 : index
    %0 = vector.load %arg1[%c0, %c0_0] : memref<16x128xbf16, #tpu.memory_space<vmem>>, vector<16x128xbf16>
    %c0_1 = arith.constant 0 : index
    %c0_2 = arith.constant 0 : index
    %1 = vector.load %arg2[%c0_1, %c0_2] : memref<128x32xbf16, #tpu.memory_space<vmem>>, vector<128x32xbf16>
    %cst = arith.constant dense<0.000000e+00> : vector<16x32xf32>
    %2 = tpu.matmul %0, %1, %cst {dimension_numbers = #tpu.dot_dimension_numbers<[1], [0], [0], [1], [0, 0, 1, 1], [], []>} : vector<16x128xbf16>, vector<128x32xbf16>, vector<16x32xf32> -> vector<16x32xf32>
    %c0_3 = arith.constant 0 : index
    %c0_4 = arith.constant 0 : index
    %3 = vector.load %arg3[%c0_3, %c0_4] : memref<32x2xf32, #tpu.memory_space<vmem>>, vector<32x2xf32>
    %cst_5 = arith.constant dense<0.000000e+00> : vector<16x2xf32>
    %4 = tpu.matmul %2, %3, %cst_5 {dimension_numbers = #tpu.dot_dimension_numbers<[1], [0], [0], [1], [0, 0, 1, 1], [], []>} : vector<16x32xf32>, vector<32x2xf32>, vector<16x2xf32> -> vector<16x2xf32>
    %5 = arith.truncf %2 : vector<16x32xf32> to vector<16x32xbf16>
    %c0_6 = arith.constant 0 : index
    %c0_7 = arith.constant 0 : index
    %6 = vector.load %arg4[%c0_6, %c0_7] : memref<16x32xbf16, #tpu.memory_space<vmem>>, vector<16x32xbf16>
    tpu.vector_store %arg4[%c0_6, %c0_7], %5 {strides = array<i32>} : memref<16x32xbf16, #tpu.memory_space<vmem>>, vector<16x32xbf16>,
    %7 = vector.extract_strided_slice %4 {offsets = [0, 0], sizes = [16, 1], strides = [1, 1]} : vector<16x2xf32> to vector<16x1xf32>
    %8 = tpu.transpose %7, [1, 0] : vector<16x1xf32> -> vector<1x16xf32>
    %c0_8 = arith.constant 0 : index
    %c0_9 = arith.constant 0 : index
    %9 = vector.load %arg5[%c0_8, %c0_9] : memref<1x16xf32, #tpu.memory_space<vmem>>, vector<1x16xf32>
    tpu.vector_store %arg5[%c0_8, %c0_9], %8 {strides = array<i32>} : memref<1x16xf32, #tpu.memory_space<vmem>>, vector<1x16xf32>,
    %10 = vector.extract_strided_slice %4 {offsets = [0, 1], sizes = [16, 1], strides = [1, 1]} : vector<16x2xf32> to vector<16x1xf32>
    %c0_10 = arith.constant 0 : index
    %c0_11 = arith.constant 0 : index
    %11 = vector.load %arg6[%c0_10, %c0_11] : memref<16x1xf32, #tpu.memory_space<vmem>>, vector<16x1xf32>
    tpu.vector_store %arg6[%c0_10, %c0_11], %10 {strides = array<i32>} : memref<16x1xf32, #tpu.memory_space<vmem>>, vector<16x1xf32>,
    return
  }
  func.func @transform_0(%arg0: i32) -> (i32, i32) {
    %c0_i32 = arith.constant 0 : i32
    %c0_i32_0 = arith.constant 0 : i32
    return %arg0, %c0_i32 : i32, i32
  }
  func.func @transform_1(%arg0: i32) -> (i32, i32) {
    %c0_i32 = arith.constant 0 : i32
    %c0_i32_0 = arith.constant 0 : i32
    %c0_i32_1 = arith.constant 0 : i32
    return %c0_i32, %c0_i32_0 : i32, i32
  }
  func.func @transform_2(%arg0: i32) -> (i32, i32) {
    %c0_i32 = arith.constant 0 : i32
    %c0_i32_0 = arith.constant 0 : i32
    %c0_i32_1 = arith.constant 0 : i32
    return %c0_i32, %c0_i32_0 : i32, i32
  }
  func.func @transform_3(%arg0: i32) -> (i32, i32) {
    %c0_i32 = arith.constant 0 : i32
    %c0_i32_0 = arith.constant 0 : i32
    return %arg0, %c0_i32 : i32, i32
  }
  func.func @transform_4(%arg0: i32) -> (i32, i32) {
    %c0_i32 = arith.constant 0 : i32
    %c0_i32_0 = arith.constant 0 : i32
    return %c0_i32, %arg0 : i32, i32
  }
  func.func @transform_5(%arg0: i32) -> (i32, i32) {
    %c0_i32 = arith.constant 0 : i32
    %c0_i32_0 = arith.constant 0 : i32
    return %arg0, %c0_i32 : i32, i32
  }
}

module attributes {stable_mosaic.version = 11 : i64} {
  func.func @_attn_kernel(%arg0: i32, %arg1: memref<16x4xf32, #tpu.memory_space<vmem>>, %arg2: memref<4x16xf32, #tpu.memory_space<vmem>>, %arg3: memref<16x128xbf16, #tpu.memory_space<vmem>>, %arg4: memref<16x16xbf16, #tpu.memory_space<vmem>>, %arg5: memref<1x128xf32, #tpu.memory_space<vmem>>, %arg6: memref<4x16x16xbf16, #tpu.memory_space<vmem>>, %arg7: memref<16x128xf32, #tpu.memory_space<vmem>>) attributes {dimension_semantics = [#tpu.dimension_semantics<parallel>], iteration_bounds = array<i64: 1>, scalar_prefetch = 0 : i64, scratch_operands = 0 : i64, tpu.core_type = #tpu.core_type<tc>, window_params = [{transform_indices = @transform_0, window_bounds = array<i64: 16, 4>}, {pipeline_mode = #tpu.pipeline_mode<synchronous>, transform_indices = @transform_1, window_bounds = array<i64: 4, 16>}, {pipeline_mode = #tpu.pipeline_mode<synchronous>, transform_indices = @transform_2, window_bounds = array<i64: 16, 128>}, {transform_indices = @transform_3, window_bounds = array<i64: 16, 16>}, {pipeline_mode = #tpu.pipeline_mode<synchronous>, transform_indices = @transform_4, window_bounds = array<i64: 1, 128>}, {transform_indices = @transform_5, window_bounds = array<i64: 4, 16, 16>}, {transform_indices = @transform_6, window_bounds = array<i64: 16, 128>}]} {
    %c0 = arith.constant 0 : index
    %c0_0 = arith.constant 0 : index
    %0 = vector.load %arg1[%c0, %c0_0] : memref<16x4xf32, #tpu.memory_space<vmem>>, vector<16x4xf32>
    %c0_1 = arith.constant 0 : index
    %c0_2 = arith.constant 0 : index
    %1 = vector.load %arg2[%c0_1, %c0_2] : memref<4x16xf32, #tpu.memory_space<vmem>>, vector<4x16xf32>
    %c0_3 = arith.constant 0 : index
    %c0_4 = arith.constant 0 : index
    %2 = vector.load %arg3[%c0_3, %c0_4] : memref<16x128xbf16, #tpu.memory_space<vmem>>, vector<16x128xbf16>
    %c0_5 = arith.constant 0 : index
    %c0_6 = arith.constant 0 : index
    %3 = vector.load %arg4[%c0_5, %c0_6] : memref<16x16xbf16, #tpu.memory_space<vmem>>, vector<16x16xbf16>
    %cst = arith.constant 0.000000e+00 : bf16
    %4 = vector.broadcast %cst : bf16 to vector<16x16xbf16>
    %5 = arith.cmpf ogt, %3, %4 : vector<16x16xbf16>
    %6 = vector.extract_strided_slice %0 {offsets = [0, 0], sizes = [16, 1], strides = [1, 1]} : vector<16x4xf32> to vector<16x1xf32>
    %7 = vector.extract_strided_slice %1 {offsets = [0, 0], sizes = [1, 16], strides = [1, 1]} : vector<4x16xf32> to vector<1x16xf32>
    %8 = vector.broadcast %6 : vector<16x1xf32> to vector<16x16xf32>
    %9 = vector.broadcast %7 : vector<1x16xf32> to vector<16x16xf32>
    %10 = arith.addf %8, %9 : vector<16x16xf32>
    %c0_7 = arith.constant 0 : index
    %c0_8 = arith.constant 0 : index
    %c0_9 = arith.constant 0 : index
    %11 = vector.load %arg6[%c0_7, %c0_8, %c0_9] : memref<4x16x16xbf16, #tpu.memory_space<vmem>>, vector<1x16x16xbf16>
    %12 = vector.shape_cast %11 : vector<1x16x16xbf16> to vector<16x16xbf16>
    %13 = arith.extf %12 : vector<16x16xbf16> to vector<16x16xf32>
    %14 = arith.addf %10, %13 : vector<16x16xf32>
    %cst_10 = arith.constant 0.000000e+00 : f32
    %15 = vector.broadcast %cst_10 : f32 to vector<16x16xf32>
    %16 = arith.cmpf ogt, %14, %15 : vector<16x16xf32>
    %cst_11 = arith.constant 2.000000e-01 : f32
    %17 = vector.broadcast %cst_11 : f32 to vector<16x16xf32>
    %18 = arith.mulf %17, %14 : vector<16x16xf32>
    %19 = arith.select %16, %14, %18 : vector<16x16xi1>, vector<16x16xf32>
    %cst_12 = arith.constant -1.000000e+30 : f32
    %20 = vector.broadcast %cst_12 : f32 to vector<16x16xf32>
    %21 = arith.select %5, %19, %20 : vector<16x16xi1>, vector<16x16xf32>
    %cst_13 = arith.constant dense<0xFF800000> : vector<16xf32>
    %22 = vector.multi_reduction <maximumf>, %21, %cst_13 [1] : vector<16x16xf32> to vector<16xf32>
    %23 = vector.shape_cast %22 : vector<16xf32> to vector<16x1xf32>
    %24 = vector.broadcast %23 : vector<16x1xf32> to vector<16x16xf32>
    %25 = arith.subf %21, %24 : vector<16x16xf32>
    %26 = math.exp %25 : vector<16x16xf32>
    %cst_14 = arith.constant dense<0.000000e+00> : vector<16xf32>
    %27 = vector.multi_reduction <add>, %26, %cst_14 [1] : vector<16x16xf32> to vector<16xf32>
    %28 = vector.shape_cast %27 : vector<16xf32> to vector<16x1xf32>
    %29 = arith.truncf %26 : vector<16x16xf32> to vector<16x16xbf16>
    %30 = vector.extract_strided_slice %2 {offsets = [0, 0], sizes = [16, 32], strides = [1, 1]} : vector<16x128xbf16> to vector<16x32xbf16>
    %cst_15 = arith.constant dense<0.000000e+00> : vector<16x32xf32>
    %31 = tpu.matmul %29, %30, %cst_15 {dimension_numbers = #tpu.dot_dimension_numbers<[1], [0], [0], [1], [0, 0, 1, 1], [], []>} : vector<16x16xbf16>, vector<16x32xbf16>, vector<16x32xf32> -> vector<16x32xf32>
    %32 = tpu.reciprocal %28 {approx = true} : vector<16x1xf32> -> vector<16x1xf32>
    %33 = vector.broadcast %32 : vector<16x1xf32> to vector<16x32xf32>
    %34 = arith.mulf %31, %33 : vector<16x32xf32>
    %35 = vector.extract_strided_slice %0 {offsets = [0, 1], sizes = [16, 1], strides = [1, 1]} : vector<16x4xf32> to vector<16x1xf32>
    %36 = vector.extract_strided_slice %1 {offsets = [1, 0], sizes = [1, 16], strides = [1, 1]} : vector<4x16xf32> to vector<1x16xf32>
    %37 = vector.broadcast %35 : vector<16x1xf32> to vector<16x16xf32>
    %38 = vector.broadcast %36 : vector<1x16xf32> to vector<16x16xf32>
    %39 = arith.addf %37, %38 : vector<16x16xf32>
    %c1 = arith.constant 1 : index
    %c0_16 = arith.constant 0 : index
    %c0_17 = arith.constant 0 : index
    %40 = vector.load %arg6[%c1, %c0_16, %c0_17] : memref<4x16x16xbf16, #tpu.memory_space<vmem>>, vector<1x16x16xbf16>
    %41 = vector.shape_cast %40 : vector<1x16x16xbf16> to vector<16x16xbf16>
    %42 = arith.extf %41 : vector<16x16xbf16> to vector<16x16xf32>
    %43 = arith.addf %39, %42 : vector<16x16xf32>
    %cst_18 = arith.constant 0.000000e+00 : f32
    %44 = vector.broadcast %cst_18 : f32 to vector<16x16xf32>
    %45 = arith.cmpf ogt, %43, %44 : vector<16x16xf32>
    %cst_19 = arith.constant 2.000000e-01 : f32
    %46 = vector.broadcast %cst_19 : f32 to vector<16x16xf32>
    %47 = arith.mulf %46, %43 : vector<16x16xf32>
    %48 = arith.select %45, %43, %47 : vector<16x16xi1>, vector<16x16xf32>
    %cst_20 = arith.constant -1.000000e+30 : f32
    %49 = vector.broadcast %cst_20 : f32 to vector<16x16xf32>
    %50 = arith.select %5, %48, %49 : vector<16x16xi1>, vector<16x16xf32>
    %cst_21 = arith.constant dense<0xFF800000> : vector<16xf32>
    %51 = vector.multi_reduction <maximumf>, %50, %cst_21 [1] : vector<16x16xf32> to vector<16xf32>
    %52 = vector.shape_cast %51 : vector<16xf32> to vector<16x1xf32>
    %53 = vector.broadcast %52 : vector<16x1xf32> to vector<16x16xf32>
    %54 = arith.subf %50, %53 : vector<16x16xf32>
    %55 = math.exp %54 : vector<16x16xf32>
    %cst_22 = arith.constant dense<0.000000e+00> : vector<16xf32>
    %56 = vector.multi_reduction <add>, %55, %cst_22 [1] : vector<16x16xf32> to vector<16xf32>
    %57 = vector.shape_cast %56 : vector<16xf32> to vector<16x1xf32>
    %58 = arith.truncf %55 : vector<16x16xf32> to vector<16x16xbf16>
    %59 = vector.extract_strided_slice %2 {offsets = [0, 32], sizes = [16, 32], strides = [1, 1]} : vector<16x128xbf16> to vector<16x32xbf16>
    %cst_23 = arith.constant dense<0.000000e+00> : vector<16x32xf32>
    %60 = tpu.matmul %58, %59, %cst_23 {dimension_numbers = #tpu.dot_dimension_numbers<[1], [0], [0], [1], [0, 0, 1, 1], [], []>} : vector<16x16xbf16>, vector<16x32xbf16>, vector<16x32xf32> -> vector<16x32xf32>
    %61 = tpu.reciprocal %57 {approx = true} : vector<16x1xf32> -> vector<16x1xf32>
    %62 = vector.broadcast %61 : vector<16x1xf32> to vector<16x32xf32>
    %63 = arith.mulf %60, %62 : vector<16x32xf32>
    %64 = vector.extract_strided_slice %0 {offsets = [0, 2], sizes = [16, 1], strides = [1, 1]} : vector<16x4xf32> to vector<16x1xf32>
    %65 = vector.extract_strided_slice %1 {offsets = [2, 0], sizes = [1, 16], strides = [1, 1]} : vector<4x16xf32> to vector<1x16xf32>
    %66 = vector.broadcast %64 : vector<16x1xf32> to vector<16x16xf32>
    %67 = vector.broadcast %65 : vector<1x16xf32> to vector<16x16xf32>
    %68 = arith.addf %66, %67 : vector<16x16xf32>
    %c2 = arith.constant 2 : index
    %c0_24 = arith.constant 0 : index
    %c0_25 = arith.constant 0 : index
    %69 = vector.load %arg6[%c2, %c0_24, %c0_25] : memref<4x16x16xbf16, #tpu.memory_space<vmem>>, vector<1x16x16xbf16>
    %70 = vector.shape_cast %69 : vector<1x16x16xbf16> to vector<16x16xbf16>
    %71 = arith.extf %70 : vector<16x16xbf16> to vector<16x16xf32>
    %72 = arith.addf %68, %71 : vector<16x16xf32>
    %cst_26 = arith.constant 0.000000e+00 : f32
    %73 = vector.broadcast %cst_26 : f32 to vector<16x16xf32>
    %74 = arith.cmpf ogt, %72, %73 : vector<16x16xf32>
    %cst_27 = arith.constant 2.000000e-01 : f32
    %75 = vector.broadcast %cst_27 : f32 to vector<16x16xf32>
    %76 = arith.mulf %75, %72 : vector<16x16xf32>
    %77 = arith.select %74, %72, %76 : vector<16x16xi1>, vector<16x16xf32>
    %cst_28 = arith.constant -1.000000e+30 : f32
    %78 = vector.broadcast %cst_28 : f32 to vector<16x16xf32>
    %79 = arith.select %5, %77, %78 : vector<16x16xi1>, vector<16x16xf32>
    %cst_29 = arith.constant dense<0xFF800000> : vector<16xf32>
    %80 = vector.multi_reduction <maximumf>, %79, %cst_29 [1] : vector<16x16xf32> to vector<16xf32>
    %81 = vector.shape_cast %80 : vector<16xf32> to vector<16x1xf32>
    %82 = vector.broadcast %81 : vector<16x1xf32> to vector<16x16xf32>
    %83 = arith.subf %79, %82 : vector<16x16xf32>
    %84 = math.exp %83 : vector<16x16xf32>
    %cst_30 = arith.constant dense<0.000000e+00> : vector<16xf32>
    %85 = vector.multi_reduction <add>, %84, %cst_30 [1] : vector<16x16xf32> to vector<16xf32>
    %86 = vector.shape_cast %85 : vector<16xf32> to vector<16x1xf32>
    %87 = arith.truncf %84 : vector<16x16xf32> to vector<16x16xbf16>
    %88 = vector.extract_strided_slice %2 {offsets = [0, 64], sizes = [16, 32], strides = [1, 1]} : vector<16x128xbf16> to vector<16x32xbf16>
    %cst_31 = arith.constant dense<0.000000e+00> : vector<16x32xf32>
    %89 = tpu.matmul %87, %88, %cst_31 {dimension_numbers = #tpu.dot_dimension_numbers<[1], [0], [0], [1], [0, 0, 1, 1], [], []>} : vector<16x16xbf16>, vector<16x32xbf16>, vector<16x32xf32> -> vector<16x32xf32>
    %90 = tpu.reciprocal %86 {approx = true} : vector<16x1xf32> -> vector<16x1xf32>
    %91 = vector.broadcast %90 : vector<16x1xf32> to vector<16x32xf32>
    %92 = arith.mulf %89, %91 : vector<16x32xf32>
    %93 = vector.extract_strided_slice %0 {offsets = [0, 3], sizes = [16, 1], strides = [1, 1]} : vector<16x4xf32> to vector<16x1xf32>
    %94 = vector.extract_strided_slice %1 {offsets = [3, 0], sizes = [1, 16], strides = [1, 1]} : vector<4x16xf32> to vector<1x16xf32>
    %95 = vector.broadcast %93 : vector<16x1xf32> to vector<16x16xf32>
    %96 = vector.broadcast %94 : vector<1x16xf32> to vector<16x16xf32>
    %97 = arith.addf %95, %96 : vector<16x16xf32>
    %c3 = arith.constant 3 : index
    %c0_32 = arith.constant 0 : index
    %c0_33 = arith.constant 0 : index
    %98 = vector.load %arg6[%c3, %c0_32, %c0_33] : memref<4x16x16xbf16, #tpu.memory_space<vmem>>, vector<1x16x16xbf16>
    %99 = vector.shape_cast %98 : vector<1x16x16xbf16> to vector<16x16xbf16>
    %100 = arith.extf %99 : vector<16x16xbf16> to vector<16x16xf32>
    %101 = arith.addf %97, %100 : vector<16x16xf32>
    %cst_34 = arith.constant 0.000000e+00 : f32
    %102 = vector.broadcast %cst_34 : f32 to vector<16x16xf32>
    %103 = arith.cmpf ogt, %101, %102 : vector<16x16xf32>
    %cst_35 = arith.constant 2.000000e-01 : f32
    %104 = vector.broadcast %cst_35 : f32 to vector<16x16xf32>
    %105 = arith.mulf %104, %101 : vector<16x16xf32>
    %106 = arith.select %103, %101, %105 : vector<16x16xi1>, vector<16x16xf32>
    %cst_36 = arith.constant -1.000000e+30 : f32
    %107 = vector.broadcast %cst_36 : f32 to vector<16x16xf32>
    %108 = arith.select %5, %106, %107 : vector<16x16xi1>, vector<16x16xf32>
    %cst_37 = arith.constant dense<0xFF800000> : vector<16xf32>
    %109 = vector.multi_reduction <maximumf>, %108, %cst_37 [1] : vector<16x16xf32> to vector<16xf32>
    %110 = vector.shape_cast %109 : vector<16xf32> to vector<16x1xf32>
    %111 = vector.broadcast %110 : vector<16x1xf32> to vector<16x16xf32>
    %112 = arith.subf %108, %111 : vector<16x16xf32>
    %113 = math.exp %112 : vector<16x16xf32>
    %cst_38 = arith.constant dense<0.000000e+00> : vector<16xf32>
    %114 = vector.multi_reduction <add>, %113, %cst_38 [1] : vector<16x16xf32> to vector<16xf32>
    %115 = vector.shape_cast %114 : vector<16xf32> to vector<16x1xf32>
    %116 = arith.truncf %113 : vector<16x16xf32> to vector<16x16xbf16>
    %117 = vector.extract_strided_slice %2 {offsets = [0, 96], sizes = [16, 32], strides = [1, 1]} : vector<16x128xbf16> to vector<16x32xbf16>
    %cst_39 = arith.constant dense<0.000000e+00> : vector<16x32xf32>
    %118 = tpu.matmul %116, %117, %cst_39 {dimension_numbers = #tpu.dot_dimension_numbers<[1], [0], [0], [1], [0, 0, 1, 1], [], []>} : vector<16x16xbf16>, vector<16x32xbf16>, vector<16x32xf32> -> vector<16x32xf32>
    %119 = tpu.reciprocal %115 {approx = true} : vector<16x1xf32> -> vector<16x1xf32>
    %120 = vector.broadcast %119 : vector<16x1xf32> to vector<16x32xf32>
    %121 = arith.mulf %118, %120 : vector<16x32xf32>
    %122 = tpu.concatenate %34, %63, %92, %121 in 1 : vector<16x32xf32>, vector<16x32xf32>, vector<16x32xf32>, vector<16x32xf32> -> vector<16x128xf32>
    %c0_40 = arith.constant 0 : index
    %c0_41 = arith.constant 0 : index
    %123 = vector.load %arg5[%c0_40, %c0_41] : memref<1x128xf32, #tpu.memory_space<vmem>>, vector<1x128xf32>
    %124 = vector.broadcast %123 : vector<1x128xf32> to vector<16x128xf32>
    %125 = arith.addf %122, %124 : vector<16x128xf32>
    %cst_42 = arith.constant 0.000000e+00 : f32
    %126 = vector.broadcast %cst_42 : f32 to vector<16x128xf32>
    %127 = arith.maximumf %125, %126 : vector<16x128xf32>
    %c0_43 = arith.constant 0 : index
    %c0_44 = arith.constant 0 : index
    %128 = vector.load %arg7[%c0_43, %c0_44] : memref<16x128xf32, #tpu.memory_space<vmem>>, vector<16x128xf32>
    tpu.vector_store %arg7[%c0_43, %c0_44], %127 {strides = array<i32>} : memref<16x128xf32, #tpu.memory_space<vmem>>, vector<16x128xf32>,
    return
  }
  func.func @transform_0(%arg0: i32) -> (i32, i32) {
    %c0_i32 = arith.constant 0 : i32
    %c0_i32_0 = arith.constant 0 : i32
    return %arg0, %c0_i32 : i32, i32
  }
  func.func @transform_1(%arg0: i32) -> (i32, i32) {
    %c0_i32 = arith.constant 0 : i32
    %c0_i32_0 = arith.constant 0 : i32
    %c0_i32_1 = arith.constant 0 : i32
    return %c0_i32, %c0_i32_0 : i32, i32
  }
  func.func @transform_2(%arg0: i32) -> (i32, i32) {
    %c0_i32 = arith.constant 0 : i32
    %c0_i32_0 = arith.constant 0 : i32
    %c0_i32_1 = arith.constant 0 : i32
    return %c0_i32, %c0_i32_0 : i32, i32
  }
  func.func @transform_3(%arg0: i32) -> (i32, i32) {
    %c0_i32 = arith.constant 0 : i32
    %c0_i32_0 = arith.constant 0 : i32
    return %arg0, %c0_i32 : i32, i32
  }
  func.func @transform_4(%arg0: i32) -> (i32, i32) {
    %c0_i32 = arith.constant 0 : i32
    %c0_i32_0 = arith.constant 0 : i32
    %c0_i32_1 = arith.constant 0 : i32
    return %c0_i32, %c0_i32_0 : i32, i32
  }
  func.func @transform_5(%arg0: i32) -> (i32, i32, i32) {
    %c0_i32 = arith.constant 0 : i32
    %c0_i32_0 = arith.constant 0 : i32
    %c0_i32_1 = arith.constant 0 : i32
    return %c0_i32, %arg0, %c0_i32_0 : i32, i32, i32
  }
  func.func @transform_6(%arg0: i32) -> (i32, i32) {
    %c0_i32 = arith.constant 0 : i32
    %c0_i32_0 = arith.constant 0 : i32
    return %arg0, %c0_i32 : i32, i32
  }
}

module attributes {stable_mosaic.version = 11 : i64} {
  func.func @_attn_kernel(%arg0: i32, %arg1: memref<16x1xf32, #tpu.memory_space<vmem>>, %arg2: memref<1x16xf32, #tpu.memory_space<vmem>>, %arg3: memref<16x32xbf16, #tpu.memory_space<vmem>>, %arg4: memref<16x16xbf16, #tpu.memory_space<vmem>>, %arg5: memref<1x32xf32, #tpu.memory_space<vmem>>, %arg6: memref<1x16x16xbf16, #tpu.memory_space<vmem>>, %arg7: memref<16x32xf32, #tpu.memory_space<vmem>>) attributes {dimension_semantics = [#tpu.dimension_semantics<parallel>], iteration_bounds = array<i64: 1>, scalar_prefetch = 0 : i64, scratch_operands = 0 : i64, tpu.core_type = #tpu.core_type<tc>, window_params = [{transform_indices = @transform_0, window_bounds = array<i64: 16, 1>}, {pipeline_mode = #tpu.pipeline_mode<synchronous>, transform_indices = @transform_1, window_bounds = array<i64: 1, 16>}, {pipeline_mode = #tpu.pipeline_mode<synchronous>, transform_indices = @transform_2, window_bounds = array<i64: 16, 32>}, {transform_indices = @transform_3, window_bounds = array<i64: 16, 16>}, {pipeline_mode = #tpu.pipeline_mode<synchronous>, transform_indices = @transform_4, window_bounds = array<i64: 1, 32>}, {transform_indices = @transform_5, window_bounds = array<i64: 1, 16, 16>}, {transform_indices = @transform_6, window_bounds = array<i64: 16, 32>}]} {
    %c0 = arith.constant 0 : index
    %c0_0 = arith.constant 0 : index
    %0 = vector.load %arg1[%c0, %c0_0] : memref<16x1xf32, #tpu.memory_space<vmem>>, vector<16x1xf32>
    %c0_1 = arith.constant 0 : index
    %c0_2 = arith.constant 0 : index
    %1 = vector.load %arg2[%c0_1, %c0_2] : memref<1x16xf32, #tpu.memory_space<vmem>>, vector<1x16xf32>
    %c0_3 = arith.constant 0 : index
    %c0_4 = arith.constant 0 : index
    %2 = vector.load %arg3[%c0_3, %c0_4] : memref<16x32xbf16, #tpu.memory_space<vmem>>, vector<16x32xbf16>
    %c0_5 = arith.constant 0 : index
    %c0_6 = arith.constant 0 : index
    %3 = vector.load %arg4[%c0_5, %c0_6] : memref<16x16xbf16, #tpu.memory_space<vmem>>, vector<16x16xbf16>
    %cst = arith.constant 0.000000e+00 : bf16
    %4 = vector.broadcast %cst : bf16 to vector<16x16xbf16>
    %5 = arith.cmpf ogt, %3, %4 : vector<16x16xbf16>
    %6 = vector.broadcast %0 : vector<16x1xf32> to vector<16x16xf32>
    %7 = vector.broadcast %1 : vector<1x16xf32> to vector<16x16xf32>
    %8 = arith.addf %6, %7 : vector<16x16xf32>
    %c0_7 = arith.constant 0 : index
    %c0_8 = arith.constant 0 : index
    %c0_9 = arith.constant 0 : index
    %9 = vector.load %arg6[%c0_7, %c0_8, %c0_9] : memref<1x16x16xbf16, #tpu.memory_space<vmem>>, vector<1x16x16xbf16>
    %10 = vector.shape_cast %9 : vector<1x16x16xbf16> to vector<16x16xbf16>
    %11 = arith.extf %10 : vector<16x16xbf16> to vector<16x16xf32>
    %12 = arith.addf %8, %11 : vector<16x16xf32>
    %cst_10 = arith.constant 0.000000e+00 : f32
    %13 = vector.broadcast %cst_10 : f32 to vector<16x16xf32>
    %14 = arith.cmpf ogt, %12, %13 : vector<16x16xf32>
    %cst_11 = arith.constant 2.000000e-01 : f32
    %15 = vector.broadcast %cst_11 : f32 to vector<16x16xf32>
    %16 = arith.mulf %15, %12 : vector<16x16xf32>
    %17 = arith.select %14, %12, %16 : vector<16x16xi1>, vector<16x16xf32>
    %cst_12 = arith.constant -1.000000e+30 : f32
    %18 = vector.broadcast %cst_12 : f32 to vector<16x16xf32>
    %19 = arith.select %5, %17, %18 : vector<16x16xi1>, vector<16x16xf32>
    %cst_13 = arith.constant dense<0xFF800000> : vector<16xf32>
    %20 = vector.multi_reduction <maximumf>, %19, %cst_13 [1] : vector<16x16xf32> to vector<16xf32>
    %21 = vector.shape_cast %20 : vector<16xf32> to vector<16x1xf32>
    %22 = vector.broadcast %21 : vector<16x1xf32> to vector<16x16xf32>
    %23 = arith.subf %19, %22 : vector<16x16xf32>
    %24 = math.exp %23 : vector<16x16xf32>
    %cst_14 = arith.constant dense<0.000000e+00> : vector<16xf32>
    %25 = vector.multi_reduction <add>, %24, %cst_14 [1] : vector<16x16xf32> to vector<16xf32>
    %26 = vector.shape_cast %25 : vector<16xf32> to vector<16x1xf32>
    %27 = arith.truncf %24 : vector<16x16xf32> to vector<16x16xbf16>
    %cst_15 = arith.constant dense<0.000000e+00> : vector<16x32xf32>
    %28 = tpu.matmul %27, %2, %cst_15 {dimension_numbers = #tpu.dot_dimension_numbers<[1], [0], [0], [1], [0, 0, 1, 1], [], []>} : vector<16x16xbf16>, vector<16x32xbf16>, vector<16x32xf32> -> vector<16x32xf32>
    %29 = tpu.reciprocal %26 {approx = true} : vector<16x1xf32> -> vector<16x1xf32>
    %30 = vector.broadcast %29 : vector<16x1xf32> to vector<16x32xf32>
    %31 = arith.mulf %28, %30 : vector<16x32xf32>
    %cst_16 = arith.constant 1.000000e+00 : f32
    %32 = vector.broadcast %cst_16 : f32 to vector<16x32xf32>
    %33 = arith.mulf %31, %32 : vector<16x32xf32>
    %c0_17 = arith.constant 0 : index
    %c0_18 = arith.constant 0 : index
    %34 = vector.load %arg5[%c0_17, %c0_18] : memref<1x32xf32, #tpu.memory_space<vmem>>, vector<1x32xf32>
    %35 = vector.broadcast %34 : vector<1x32xf32> to vector<16x32xf32>
    %36 = arith.addf %33, %35 : vector<16x32xf32>
    %c0_19 = arith.constant 0 : index
    %c0_20 = arith.constant 0 : index
    %37 = vector.load %arg7[%c0_19, %c0_20] : memref<16x32xf32, #tpu.memory_space<vmem>>, vector<16x32xf32>
    tpu.vector_store %arg7[%c0_19, %c0_20], %36 {strides = array<i32>} : memref<16x32xf32, #tpu.memory_space<vmem>>, vector<16x32xf32>,
    return
  }
  func.func @transform_0(%arg0: i32) -> (i32, i32) {
    %c0_i32 = arith.constant 0 : i32
    %c0_i32_0 = arith.constant 0 : i32
    return %arg0, %c0_i32 : i32, i32
  }
  func.func @transform_1(%arg0: i32) -> (i32, i32) {
    %c0_i32 = arith.constant 0 : i32
    %c0_i32_0 = arith.constant 0 : i32
    %c0_i32_1 = arith.constant 0 : i32
    return %c0_i32, %c0_i32_0 : i32, i32
  }
  func.func @transform_2(%arg0: i32) -> (i32, i32) {
    %c0_i32 = arith.constant 0 : i32
    %c0_i32_0 = arith.constant 0 : i32
    %c0_i32_1 = arith.constant 0 : i32
    return %c0_i32, %c0_i32_0 : i32, i32
  }
  func.func @transform_3(%arg0: i32) -> (i32, i32) {
    %c0_i32 = arith.constant 0 : i32
    %c0_i32_0 = arith.constant 0 : i32
    return %arg0, %c0_i32 : i32, i32
  }
  func.func @transform_4(%arg0: i32) -> (i32, i32) {
    %c0_i32 = arith.constant 0 : i32
    %c0_i32_0 = arith.constant 0 : i32
    %c0_i32_1 = arith.constant 0 : i32
    return %c0_i32, %c0_i32_0 : i32, i32
  }
  func.func @transform_5(%arg0: i32) -> (i32, i32, i32) {
    %c0_i32 = arith.constant 0 : i32
    %c0_i32_0 = arith.constant 0 : i32
    %c0_i32_1 = arith.constant 0 : i32
    return %c0_i32, %arg0, %c0_i32_0 : i32, i32, i32
  }
  func.func @transform_6(%arg0: i32) -> (i32, i32) {
    %c0_i32 = arith.constant 0 : i32
    %c0_i32_0 = arith.constant 0 : i32
    return %arg0, %c0_i32 : i32, i32
  }
}

module attributes {stable_mosaic.version = 11 : i64} {
  func.func @_linear_kernel(%arg0: memref<2x16xf32, #tpu.memory_space<vmem>>, %arg1: memref<16x32xf32, #tpu.memory_space<vmem>>, %arg2: memref<1x32xf32, #tpu.memory_space<vmem>>, %arg3: memref<2x32xf32, #tpu.memory_space<vmem>>) attributes {dimension_semantics = [], scalar_prefetch = 0 : i64, scratch_operands = 0 : i64, tpu.core_type = #tpu.core_type<tc>} {
    %c0 = arith.constant 0 : index
    %c0_0 = arith.constant 0 : index
    %0 = vector.load %arg0[%c0, %c0_0] : memref<2x16xf32, #tpu.memory_space<vmem>>, vector<2x16xf32>
    %1 = arith.truncf %0 : vector<2x16xf32> to vector<2x16xbf16>
    %c0_1 = arith.constant 0 : index
    %c0_2 = arith.constant 0 : index
    %2 = vector.load %arg1[%c0_1, %c0_2] : memref<16x32xf32, #tpu.memory_space<vmem>>, vector<16x32xf32>
    %3 = arith.truncf %2 : vector<16x32xf32> to vector<16x32xbf16>
    %cst = arith.constant dense<0.000000e+00> : vector<2x32xf32>
    %4 = tpu.matmul %1, %3, %cst {dimension_numbers = #tpu.dot_dimension_numbers<[1], [0], [0], [1], [0, 0, 1, 1], [], []>} : vector<2x16xbf16>, vector<16x32xbf16>, vector<2x32xf32> -> vector<2x32xf32>
    %c0_3 = arith.constant 0 : index
    %c0_4 = arith.constant 0 : index
    %5 = vector.load %arg2[%c0_3, %c0_4] : memref<1x32xf32, #tpu.memory_space<vmem>>, vector<1x32xf32>
    %6 = vector.broadcast %5 : vector<1x32xf32> to vector<2x32xf32>
    %7 = arith.addf %4, %6 : vector<2x32xf32>
    %c0_5 = arith.constant 0 : index
    %c0_6 = arith.constant 0 : index
    %8 = vector.load %arg3[%c0_5, %c0_6] : memref<2x32xf32, #tpu.memory_space<vmem>>, vector<2x32xf32>
    tpu.vector_store %arg3[%c0_5, %c0_6], %7 {strides = array<i32>} : memref<2x32xf32, #tpu.memory_space<vmem>>, vector<2x32xf32>,
    return
  }
}

module attributes {stable_mosaic.version = 11 : i64} {
  func.func @_linear_kernel(%arg0: memref<2x64xf32, #tpu.memory_space<vmem>>, %arg1: memref<64x1xf32, #tpu.memory_space<vmem>>, %arg2: memref<1x1xf32, #tpu.memory_space<vmem>>, %arg3: memref<2x1xf32, #tpu.memory_space<vmem>>) attributes {dimension_semantics = [], scalar_prefetch = 0 : i64, scratch_operands = 0 : i64, tpu.core_type = #tpu.core_type<tc>} {
    %c0 = arith.constant 0 : index
    %c0_0 = arith.constant 0 : index
    %0 = vector.load %arg0[%c0, %c0_0] : memref<2x64xf32, #tpu.memory_space<vmem>>, vector<2x64xf32>
    %1 = arith.truncf %0 : vector<2x64xf32> to vector<2x64xbf16>
    %c0_1 = arith.constant 0 : index
    %c0_2 = arith.constant 0 : index
    %2 = vector.load %arg1[%c0_1, %c0_2] : memref<64x1xf32, #tpu.memory_space<vmem>>, vector<64x1xf32>
    %3 = arith.truncf %2 : vector<64x1xf32> to vector<64x1xbf16>
    %cst = arith.constant dense<0.000000e+00> : vector<2x1xf32>
    %4 = tpu.matmul %1, %3, %cst {dimension_numbers = #tpu.dot_dimension_numbers<[1], [0], [0], [1], [0, 0, 1, 1], [], []>} : vector<2x64xbf16>, vector<64x1xbf16>, vector<2x1xf32> -> vector<2x1xf32>
    %c0_3 = arith.constant 0 : index
    %c0_4 = arith.constant 0 : index
    %5 = vector.load %arg2[%c0_3, %c0_4] : memref<1x1xf32, #tpu.memory_space<vmem>>, vector<1x1xf32>
    %6 = vector.broadcast %5 : vector<1x1xf32> to vector<2x1xf32>
    %7 = arith.addf %4, %6 : vector<2x1xf32>
    %cst_5 = arith.constant 0.000000e+00 : f32
    %8 = vector.broadcast %cst_5 : f32 to vector<2x1xf32>
    %9 = arith.subf %8, %7 : vector<2x1xf32>
    %10 = math.exp %9 : vector<2x1xf32>
    %cst_6 = arith.constant 1.000000e+00 : f32
    %11 = vector.broadcast %cst_6 : f32 to vector<2x1xf32>
    %12 = arith.addf %11, %10 : vector<2x1xf32>
    %cst_7 = arith.constant 1.000000e+00 : f32
    %13 = vector.broadcast %cst_7 : f32 to vector<2x1xf32>
    %14 = arith.divf %13, %12 : vector<2x1xf32>
    %c0_8 = arith.constant 0 : index
    %c0_9 = arith.constant 0 : index
    %15 = vector.load %arg3[%c0_8, %c0_9] : memref<2x1xf32, #tpu.memory_space<vmem>>, vector<2x1xf32>
    tpu.vector_store %arg3[%c0_8, %c0_9], %14 {strides = array<i32>} : memref<2x1xf32, #tpu.memory_space<vmem>>, vector<2x1xf32>,
    return
  }
}

</mosaic_0001>

<bundles_post_ra>
// kernel: enhanced_gat_forward.15
= control target key start
LH: loop header
LB: loop body
LE: loop exit
PB: predicated region body
PF: predicated region fallthrough
CT: control target
= control target key end

     0   :  { %vm30_vm0 = vcmask 1043456   ;;  %v341_v0 = vmov 0.0   ;;  %vm342_vm1 = vmmov 0   ;;  %vm26_vm2 = vcmask 64512   ;;  %s440_s1 = inlined_call_operand.vmem [shape: bf16[8,128], index: 1, kind: input, shape index: {}]   ;;  %s441_s0 = inlined_call_operand.vmem [shape: bf16[16,8], index: 0, kind: input, shape index: {}]   ;;  %s442_s2 = inlined_call_operand.vmem [shape: f32[128,8], index: 2, kind: input, shape index: {}]   ;;  %s443_s3 = inlined_call_operand.vmem [shape: bf16[16,128], index: 3, kind: output, shape index: {0}]   ;;  %s444_s5 = inlined_call_operand.vmem [shape: f32[16,4], index: 5, kind: output, shape index: {2}]   ;;  %s445_s4 = inlined_call_operand.vmem [shape: f32[4,16], index: 4, kind: output, shape index: {1}]  }
   0x1   :  { %264 = vmatprep.subr.bf16.mxu0 %v341_v0  ;;  %v20_v1 = vld [vmem:[%s440_s1] sm:$0xf]  ;;  %266 = vmatprep.mubr.msk.bf16.mxu0 %vm342_vm1, %v341_v0  ;;  %v76_v5 = vld [vmem:[%s442_s2 + $0x8] sm:$0xff]  ;;  %v77_v7 = vld [vmem:[%s442_s2 + $0x10] sm:$0xff]  ;;  %vm218_vm3 = vcmask 31744   ;;  %vm208_vm4 = vcmask 125952  }
   0x2   :  { %v32_v2 = vsel %vm30_vm0, %v20_v1, 0  ;;  %v340_v3 = vld [vmem:[%s441_s0] sm:$0xff]   ;;  %v78_v8 = vld [vmem:[%s442_s2 + $0x18] sm:$0xff]  ;;  %v80_v11 = vld [vmem:[%s442_s2 + $0x28] sm:$0xff] }
   0x3   :  { %v75_v4 = vld [vmem:[%s442_s2] sm:$0xff]  ;;  %265 = vmatpush3.bf16.msra.mxu0 %v32_v2  ;;  %v309_v9 = vpack.c.bf16 %v78_v8, %v77_v7  ;;  %v81_v13 = vld [vmem:[%s442_s2 + $0x30] sm:$0xff]  ;;  %v82_v14 = vld [vmem:[%s442_s2 + $0x38] sm:$0xff] }
   0x4   :  { %v305_v6 = vpack.c.bf16 %v76_v5, %v75_v4  ;;  %v79_v10 = vld [vmem:[%s442_s2 + $0x20] sm:$0xff]  ;;  %v317_v15 = vpack.c.bf16 %v82_v14, %v81_v13  ;;  %v84_v17 = vld [vmem:[%s442_s2 + $0x48] sm:$0xff]  ;;  %v85_v19 = vld [vmem:[%s442_s2 + $0x50] sm:$0xff] }
   0x5   :  { %v313_v12 = vpack.c.bf16 %v80_v11, %v79_v10  ;;  %v83_v16 = vld [vmem:[%s442_s2 + $0x40] sm:$0xff]  ;;  %v86_v20 = vld [vmem:[%s442_s2 + $0x58] sm:$0xff]  ;;  %v88_v23 = vld [vmem:[%s442_s2 + $0x68] sm:$0xff] }
   0x6   :  { %306 = vmatprep.subr.bf16.mxu1 %v305_v6  ;;  %267 = vmatmul.mubr.msk.bf16.vlgmr.msra.gmra.mrb[0].mxu0 %vm26_vm2, %v340_v3  ;;  %v321_v18 = vpack.c.bf16 %v84_v17, %v83_v16  ;;  %v325_v21 = vpack.c.bf16 %v86_v20, %v85_v19  ;;  %v87_v22 = vld [vmem:[%s442_s2 + $0x60] sm:$0xff]  ;;  %v89_v25 = vld [vmem:[%s442_s2 + $0x70] sm:$0xff]  ;;  %v90_v26 = vld [vmem:[%s442_s2 + $0x78] sm:$0xff]  ;;  %s343_s2 = smov 124  }
   0x7   :  { %308 = vmatpush3.bf16.msra.mxu1 %v305_v6  ;;  %v329_v24 = vpack.c.bf16 %v88_v23, %v87_v22  ;;  %v333_v27 = vpack.c.bf16 %v90_v26, %v89_v25 }
   0x8   :  { %310 = vmatprep.subr.bf16.mxu1 %v309_v9 }
   0xb   :  { %312 = vmatpush3.bf16.msra.mxu1 %v309_v9 }
   0xc   :  { %314 = vmatprep.subr.bf16.mxu1 %v313_v12 }
   0xf   :  { %316 = vmatpush3.bf16.msra.mxu1 %v313_v12 }
  0x10   :  { %318 = vmatprep.subr.bf16.mxu1 %v317_v15 }
  0x13   :  { %320 = vmatpush3.bf16.msra.mxu1 %v317_v15 }
  0x14   :  { %322 = vmatprep.subr.bf16.mxu1 %v321_v18 }
  0x17   :  { %324 = vmatpush3.bf16.msra.mxu1 %v321_v18 }
  0x18   :  { %326 = vmatprep.subr.bf16.mxu1 %v325_v21 }
  0x1b   :  { %328 = vmatpush3.bf16.msra.mxu1 %v325_v21 }
  0x1c   :  { %330 = vmatprep.subr.bf16.mxu1 %v329_v24 }
  0x1f   :  { %332 = vmatpush3.bf16.msra.mxu1 %v329_v24 }
  0x20   :  { %334 = vmatprep.subr.bf16.mxu1 %v333_v27 }
  0x23   :  { %336 = vmatpush3.bf16.msra.mxu1 %v333_v27 }
  0xd9   :  { %v68_v28 = vpop.f32.mrb[0].mxu0 }
  0xda   :  { %v268_v29 = vpop.f32.mrb[1].mxu0  ;;  %302 = vmatprep.mubr.f32.mxu1 %v68_v28 }
  0xdb   :  { %v71_v30 = vpop.f32.mrb[2].mxu0 }
  0xdc   :  { %v242_v31 = vpack.c.bf16 %v71_v30, %v68_v28  ;;  %v269_v32 = vpop.f32.mrb[3].mxu0  ;;  %303 = vmatmul.mubr.f32.vlgmr.msra.gmra.mrb[0].mxu1 %v71_v30 }
  0xde   :  { %243 = vst [vmem:[%s443_s3] sm:$0xff] %v242_v31  }
 0x1af   :  { %v304_v33 = vpop.f32.mrb[0].mxu1 }
 0x1b0   :  { %v157_v34 = vpop.f32.mrb[1].mxu1 }
 0x1b1   :  { %176 = vxpose.xlu1.b32.start [1/2] (short) (narrow) %v157_v34, 8  ;;  %212 = vrot.lane.b32.xlu0 %v157_v34, %s343_s2 }
 0x1b5   :  { %177 = vxpose.xlu1.b32.end [2/2] (short) (narrow) %v304_v33, 8  ;;  %214 = vrot.lane.b32.xlu0 %v304_v33, %s343_s2 }
 0x223   :  { %v213_v35 = vpop.permute.xlu0 %212 }
 0x224   :  { %219 = vst.msk [vmem:[%s444_s5] sm:$0xff] %vm218_vm3, %v213_v35 }
 0x227   :  { %v215_v36 = vpop.permute.xlu0 %214 }
 0x228   :  { %220 = vst.msk [vmem:[%s444_s5 + $0x8] sm:$0xff] %vm218_vm3, %v215_v36 }
 0x231   :  { %v192_v37 = vpop.trf.xlu1 }
 0x232   :  { %209 = vst.msk [vmem:[%s445_s4] sm:$0xf] %vm208_vm4, %v192_v37 }

// kernel: enhanced_gat_forward.16
= control target key start
LH: loop header
LB: loop body
LE: loop exit
PB: predicated region body
PF: predicated region fallthrough
CT: control target
= control target key end

     0   :  { %v548_v0 = vmov 1   ;;  %v549_v1 = vmov 0   ;;  %v550_v4 = vmov 2   ;;  %v551_v5 = vmov 3   ;;  %s552_s24 = smov 96   ;;  %s693_s0 = inlined_call_operand.vmem [shape: f32[16,4], index: 0, kind: input, shape index: {}]   ;;  %s694_s2 = inlined_call_operand.vmem [shape: bf16[16,128], index: 2, kind: input, shape index: {}]   ;;  %s695_s3 = inlined_call_operand.vmem [shape: bf16[16,16], index: 3, kind: input, shape index: {}]   ;;  %s696_s1 = inlined_call_operand.vmem [shape: f32[4,16], index: 1, kind: input, shape index: {}]   ;;  %s697_s4 = inlined_call_operand.vmem [shape: f32[1,128], index: 4, kind: input, shape index: {}]   ;;  %s698_s5 = inlined_call_operand.vmem [shape: f32[16,128], index: 5, kind: output, shape index: {}]  }
   0x1   :  { %510 = vset.pattern.permute.xlu1 %v548_v0  ;;  %509 = vset.pattern.permute.xlu0 %v549_v1  ;;  %v23_v2 = vld [vmem:[%s693_s0] sm:$0xff]  ;;  %v24_v3 = vld [vmem:[%s693_s0 + $0x8] sm:$0xff]  ;;  %v553_v7 = vmov 0.0   ;;  %v42_v8 = vlaneseq  ;;  %vm62_vm5 = vcmask 130048   ;;  %vm555_vm13 = vmmov 0  }
   0x2   :  { %137 = vperm.xlu1 %510, %v23_v2   ;;  %34 = vperm.xlu0 %509, %v23_v2   ;;  %v596_v6 = vld [vmem:[%s694_s2] sm:$0xff]   ;;  %vm436_vm14 = vcmask 261120   ;;  %vm439_vm15 = vcmask 523264  }
   0x3   :  { %482 = vmatprep.subr.bf16.mxu1 %v553_v7  ;;  %476 = vmatprep.subr.bf16.mxu0 %v553_v7  ;;  %v28_v9 = vld [vmem:[%s695_s3] sm:$0xf]  ;;  %v43_v10 = vshrl.u32 %v42_v8, 7  ;;  %v29_v11 = vld [vmem:[%s695_s3 + $0x4] sm:$0xf]  ;;  %s556_s3 = smov 64  }
   0x4   :  { %477 = vmatpush3.bf16.msra.mxu0 %v596_v6  ;;  %vm30_vm0 = vcmp.gt.bf16.partialorder %v28_v9, 0  ;;  %v25_v14 = vld [vmem:[%s696_s1] sm:$0xf]  ;;  %vm31_vm1 = vcmp.gt.bf16.partialorder %v29_v11, 0  ;;  %s554_s1 = smov 32   ;;  %478 = vmatprep.mubr.msk.bf16.mxu0 %vm555_vm13, %v553_v7 }
   0x5   :  { %488 = vmatprep.subr.bf16.mxu0 %v553_v7  ;;  %v146_v12 = vsub.s32 1, %v43_v10  ;;  %v44_v13 = vsub.s32 0, %v43_v10  ;;  %v54_v15 = vsel %vm30_vm0, 65537, %v549_v1  ;;  %v55_v19 = vsel %vm31_vm1, 65537, %v549_v1  ;;  %484 = vmatprep.mubr.msk.bf16.mxu1 %vm555_vm13, %v553_v7 }
   0x6   :  { %141 = vperm.xlu1 %510, %v24_v3   ;;  %39 = vperm.xlu0 %509, %v24_v3   ;;  %v56_v18 = vunpack.c.l.b16 %v54_v15  ;;  %v57_v24 = vunpack.c.l.b16 %v55_v19  ;;  %v238_v26 = vsub.s32 2, %v43_v10  ;;  %v330_v41 = vsub.s32 3, %v43_v10 }
   0x7   :  { %v147_v16 = vrot.slane %v25_v14, %v146_v12  ;;  %v45_v17 = vrot.slane %v25_v14, %v44_v13  ;;  %vm442_vm0 = vcmask 785408  }
   0x8   :  { %vm613_vm2 = vcmp.ne.s32.totalorder %v56_v18, 0  ;;  %vm617_vm6 = vcmp.ne.s32.totalorder %v57_v24, 0  ;;  %v239_v37 = vrot.slane %v25_v14, %v238_v26  ;;  %v331_v52 = vrot.slane %v25_v14, %v330_v41 }
   0xa   :  { %512 = vset.pattern.permute.xlu1 %v550_v4  ;;  %511 = vset.pattern.permute.xlu0 %v550_v4 }
   0xb   :  { %233 = vperm.xlu1 %512, %v24_v3   ;;  %229 = vperm.xlu0 %511, %v23_v2  }
   0xf   :  { %513 = vset.pattern.permute.xlu1 %v551_v5  ;;  %514 = vset.pattern.permute.xlu0 %v551_v5 }
  0x10   :  { %321 = vperm.xlu1 %513, %v23_v2   ;;  %325 = vperm.xlu0 %514, %v24_v3  }
  0x14   :  { %177 = vrot.lane.b32.xlu1 %v596_v6, %s552_s24 }
  0x81   :  { %v138_v20 = vpop.permute.xlu1 %137  ;;  %v35_v21 = vpop.permute.xlu0 %34 }
  0x82   :  { %v148_v22 = vadd.f32 %v147_v16, %v138_v20  ;;  %v46_v23 = vadd.f32 %v45_v17, %v35_v21 }
  0x84   :  { %v152_v27 = vmul.f32 0.2, %v148_v22  ;;  %v50_v28 = vmul.f32 0.2, %v46_v23  ;;  %vm48_vm3 = vcmp.gt.f32.partialorder %v46_v23, 0.0  ;;  %vm150_vm4 = vcmp.gt.f32.partialorder %v148_v22, 0.0 }
  0x85   :  { %v142_v29 = vpop.permute.xlu1 %141  ;;  %v40_v30 = vpop.permute.xlu0 %39 }
  0x86   :  { %v149_v31 = vadd.f32 %v147_v16, %v142_v29  ;;  %v47_v32 = vadd.f32 %v45_v17, %v40_v30  ;;  %v52_v33 = vsel %vm48_vm3, %v46_v23, %v50_v28  ;;  %v154_v34 = vsel %vm150_vm4, %v148_v22, %v152_v27 }
  0x87   :  { %v623_v36 = vsel %vm613_vm2, %v52_v33, -1e+30  ;;  %v629_v42 = vsel %vm613_vm2, %v154_v34, -1e+30 }
  0x88   :  { %v153_v38 = vmul.f32 0.2, %v149_v31  ;;  %v51_v39 = vmul.f32 0.2, %v47_v32  ;;  %v63_v40 = vsel %vm62_vm5, %v623_v36, -inf  ;;  %vm49_vm7 = vcmp.gt.f32.partialorder %v47_v32, 0.0 }
  0x89   :  { %64 = vmax.xlane.f32.xlu1 %v63_v40  ;;  %vm151_vm8 = vcmp.gt.f32.partialorder %v149_v31, 0.0  ;;  %v158_v50 = vsel %vm62_vm5, %v629_v42, -inf }
  0x8a   :  { %v234_v43 = vpop.permute.xlu1 %233  ;;  %v230_v44 = vpop.permute.xlu0 %229  ;;  %v53_v45 = vsel %vm49_vm7, %v47_v32, %v51_v39  ;;  %v155_v46 = vsel %vm151_vm8, %v149_v31, %v153_v38 }
  0x8b   :  { %v241_v47 = vadd.f32 %v239_v37, %v234_v43  ;;  %v240_v48 = vadd.f32 %v239_v37, %v230_v44  ;;  %v61_v49 = vsel %vm617_vm6, %v53_v45, -1e+30  ;;  %v157_v53 = vsel %vm617_vm6, %v155_v46, -1e+30 }
  0x8c   :  { %v66_v51 = vsel %vm62_vm5, %v61_v49, -inf  ;;  %v161_v62 = vsel %vm62_vm5, %v157_v53, -inf }
  0x8d   :  { %v245_v54 = vmul.f32 0.2, %v241_v47  ;;  %v244_v55 = vmul.f32 0.2, %v240_v48  ;;  %159 = vmax.xlane.f32.xlu1 %v158_v50  ;;  %67 = vmax.xlane.f32.xlu0 %v66_v51  ;;  %vm242_vm9 = vcmp.gt.f32.partialorder %v240_v48, 0.0  ;;  %vm243_vm10 = vcmp.gt.f32.partialorder %v241_v47, 0.0 }
  0x8f   :  { %v322_v56 = vpop.permute.xlu1 %321  ;;  %v326_v57 = vpop.permute.xlu0 %325  ;;  %v246_v58 = vsel %vm242_vm9, %v240_v48, %v244_v55  ;;  %v247_v59 = vsel %vm243_vm10, %v241_v47, %v245_v54 }
  0x90   :  { %v332_v60 = vadd.f32 %v331_v52, %v322_v56  ;;  %v333_v61 = vadd.f32 %v331_v52, %v326_v57  ;;  %v248_v63 = vsel %vm613_vm2, %v246_v58, -1e+30  ;;  %v249_v1 = vsel %vm617_vm6, %v247_v59, -1e+30 }
  0x91   :  { %162 = vmax.xlane.f32.xlu0 %v161_v62  ;;  %v250_v0 = vsel %vm62_vm5, %v248_v63, -inf  ;;  %v253_v5 = vsel %vm62_vm5, %v249_v1, -inf }
  0x92   :  { %v336_v2 = vmul.f32 0.2, %v332_v60  ;;  %v337_v3 = vmul.f32 0.2, %v333_v61  ;;  %251 = vmax.xlane.f32.xlu1 %v250_v0  ;;  %vm334_vm11 = vcmp.gt.f32.partialorder %v332_v60, 0.0  ;;  %vm335_vm12 = vcmp.gt.f32.partialorder %v333_v61, 0.0 }
  0x93   :  { %v178_v4 = vpop.permute.xlu1 %177 }
  0x94   :  { %v338_v8 = vsel %vm334_vm11, %v332_v60, %v336_v2  ;;  %v339_v9 = vsel %vm335_vm12, %v333_v61, %v337_v3  ;;  %483 = vmatpush3.bf16.msra.mxu1 %v178_v4 }
  0x95   :  { %254 = vmax.xlane.f32.xlu0 %v253_v5  ;;  %v340_v10 = vsel %vm613_vm2, %v338_v8, -1e+30  ;;  %v341_v11 = vsel %vm617_vm6, %v339_v9, -1e+30  ;;  %494 = vmatprep.subr.bf16.mxu1 %v553_v7 }
  0x96   :  { %v342_v12 = vsel %vm62_vm5, %v340_v10, -inf  ;;  %v345_v13 = vsel %vm62_vm5, %v341_v11, -inf }
  0x97   :  { %343 = vmax.xlane.f32.xlu1 %v342_v12 }
  0x99   :  { %346 = vmax.xlane.f32.xlu0 %v345_v13 }
  0xa8   :  { %361 = vrot.lane.b32.xlu1 %v596_v6, %s554_s1 }
  0xaf   :  { %269 = vrot.lane.b32.xlu0 %v596_v6, %s556_s3 }
 0x116   :  { %v65_v14 = vpop.xlane.xlu1 %64 }
 0x117   :  { %v69_v15 = vsub.f32 %v623_v36, %v65_v14 }
 0x119   :  { %v71_v16 = vmul.f32 1.442695, %v69_v15 }
 0x11a   :  { %v160_v17 = vpop.xlane.xlu1 %159  ;;  %v68_v18 = vpop.xlane.xlu0 %67 }
 0x11b   :  { %v164_v19 = vsub.f32 %v629_v42, %v160_v17  ;;  %v70_v20 = vsub.f32 %v61_v49, %v68_v18  ;;  %516 = vpow2.f32 %v71_v16 }
 0x11d   :  { %v166_v21 = vmul.f32 1.442695, %v164_v19  ;;  %v73_v22 = vmul.f32 1.442695, %v70_v20 }
 0x11e   :  { %v163_v23 = vpop.xlane.xlu0 %162 }
 0x11f   :  { %518 = vpow2.f32 %v166_v21  ;;  %v165_v24 = vsub.f32 %v157_v53, %v163_v23  ;;  %v252_v25 = vpop.xlane.xlu1 %251 }
 0x120   :  { %520 = vpow2.f32 %v73_v22  ;;  %v256_v26 = vsub.f32 %v248_v63, %v252_v25 }
 0x121   :  { %v168_v27 = vmul.f32 1.442695, %v165_v24 }
 0x122   :  { %v258_v6 = vmul.f32 1.442695, %v256_v26  ;;  %v255_v28 = vpop.xlane.xlu0 %254 }
 0x123   :  { %522 = vpow2.f32 %v168_v27  ;;  %v257_v29 = vsub.f32 %v249_v1, %v255_v28 }
 0x124   :  { %v344_v30 = vpop.xlane.xlu1 %343  ;;  %524 = vpow2.f32 %v258_v6 }
 0x125   :  { %v260_v31 = vmul.f32 1.442695, %v257_v29  ;;  %v348_v32 = vsub.f32 %v340_v10, %v344_v30  ;;  %v517_v36 = vpop.eup %516 }
 0x126   :  { %v347_v33 = vpop.xlane.xlu0 %346 }
 0x127   :  { %526 = vpow2.f32 %v260_v31  ;;  %v350_v34 = vmul.f32 1.442695, %v348_v32  ;;  %v349_v35 = vsub.f32 %v341_v11, %v347_v33 }
 0x128   :  { %v362_v44 = vpop.permute.xlu1 %361 }
 0x129   :  { %v519_v37 = vpop.eup %518  ;;  %528 = vpow2.f32 %v350_v34  ;;  %v352_v38 = vmul.f32 1.442695, %v349_v35 }
 0x12a   :  { %v521_v39 = vpop.eup %520  ;;  %v170_v40 = vsel %vm62_vm5, %v519_v37, 0.0  ;;  %v270_v41 = vpop.permute.xlu0 %269 }
 0x12b   :  { %530 = vpow2.f32 %v352_v38  ;;  %171 = vadd.xlane.f32.xlu1 %v170_v40  ;;  %v81_v42 = vpack.c.bf16 %v521_v39, %v517_v36  ;;  %v78_v57 = vsel %vm62_vm5, %v521_v39, 0.0  ;;  %v467_v40 = vld [vmem:[%s697_s4] ss:$0 sm:$0xff] }
 0x12d   :  { %v523_v43 = vpop.eup %522  ;;  %479 = vmatmul.mubr.msk.bf16.vlgmr.msra.gmra.mrb[0].mxu0 %vm62_vm5, %v81_v42 }
 0x12e   :  { %489 = vmatpush3.bf16.msra.mxu0 %v270_v41  ;;  %v173_v45 = vsel %vm62_vm5, %v523_v43, 0.0  ;;  %v176_v46 = vpack.c.bf16 %v523_v43, %v519_v37  ;;  %490 = vmatprep.mubr.msk.bf16.mxu0 %vm555_vm13, %v553_v7  ;;  %v525_v47 = vpop.eup %524 }
 0x12f   :  { %174 = vadd.xlane.f32.xlu0 %v173_v45  ;;  %v262_v49 = vsel %vm62_vm5, %v525_v47, 0.0 }
 0x130   :  { %485 = vmatmul.mubr.msk.bf16.vlgmr.msra.gmra.mrb[0].mxu1 %vm62_vm5, %v176_v46 }
 0x131   :  { %v527_v48 = vpop.eup %526  ;;  %495 = vmatpush3.bf16.msra.mxu1 %v362_v44  ;;  %496 = vmatprep.mubr.msk.bf16.mxu1 %vm555_vm13, %v553_v7  ;;  %v75_v7 = vsel %vm62_vm5, %v517_v36, 0.0 }
 0x132   :  { %v265_v50 = vsel %vm62_vm5, %v527_v48, 0.0  ;;  %v268_v51 = vpack.c.bf16 %v527_v48, %v525_v47 }
 0x133   :  { %v529_v52 = vpop.eup %528  ;;  %263 = vadd.xlane.f32.xlu0 %v262_v49  ;;  %266 = vadd.xlane.f32.xlu1 %v265_v50 }
 0x134   :  { %v354_v54 = vsel %vm62_vm5, %v529_v52, 0.0 }
 0x135   :  { %v531_v53 = vpop.eup %530  ;;  %491 = vmatmul.mubr.msk.bf16.vlgmr.msra.gmra.mrb[4].mxu0 %vm62_vm5, %v268_v51 }
 0x136   :  { %v357_v55 = vsel %vm62_vm5, %v531_v53, 0.0  ;;  %v360_v56 = vpack.c.bf16 %v531_v53, %v529_v52 }
 0x137   :  { %355 = vadd.xlane.f32.xlu0 %v354_v54  ;;  %358 = vadd.xlane.f32.xlu1 %v357_v55 }
 0x138   :  { %497 = vmatmul.mubr.msk.bf16.vlgmr.msra.gmra.mrb[4].mxu1 %vm62_vm5, %v360_v56 }
 0x13b   :  { %76 = vadd.xlane.f32.xlu0 %v75_v7  ;;  %79 = vadd.xlane.f32.xlu1 %v78_v57 }
 0x1b8   :  { %v172_v59 = vpop.xlane.xlu1 %171 }
 0x1b9   :  { %532 = vrcp.f32 %v172_v59 }
 0x1bc   :  { %v175_v58 = vpop.xlane.xlu0 %174 }
 0x1bd   :  { %534 = vrcp.f32 %v175_v58 }
 0x1c0   :  { %v267_v60 = vpop.xlane.xlu1 %266  ;;  %v264_v61 = vpop.xlane.xlu0 %263 }
 0x1c1   :  { %536 = vrcp.f32 %v264_v61 }
 0x1c2   :  { %538 = vrcp.f32 %v267_v60 }
 0x1c3   :  { %v533_v3 = vpop.eup %532 }
 0x1c4   :  { %v359_v62 = vpop.xlane.xlu1 %358  ;;  %v356_v63 = vpop.xlane.xlu0 %355 }
 0x1c5   :  { %540 = vrcp.f32 %v359_v62 }
 0x1c6   :  { %542 = vrcp.f32 %v356_v63 }
 0x1c7   :  { %v535_v10 = vpop.eup %534 }
 0x1c8   :  { %v77_v29 = vpop.xlane.xlu0 %76  ;;  %v80_v30 = vpop.xlane.xlu1 %79 }
 0x1c9   :  { %544 = vrcp.f32 %v77_v29 }
 0x1ca   :  { %546 = vrcp.f32 %v80_v30 }
 0x1cb   :  { %v537_v15 = vpop.eup %536 }
 0x1cc   :  { %v539_v17 = vpop.eup %538 }
 0x1cf   :  { %v541_v23 = vpop.eup %540 }
 0x1d0   :  { %v543_v25 = vpop.eup %542 }
 0x1d3   :  { %v545_v33 = vpop.eup %544 }
 0x1d4   :  { %v547_v35 = vpop.eup %546 }
 0x200   :  { %v125_v0 = vpop.f32.mrb[0].mxu0 }
 0x201   :  { %v480_v1 = vpop.f32.mrb[1].mxu0  ;;  %v134_v36 = vmul.f32 %v545_v33, %v125_v0 }
 0x202   :  { %v128_v2 = vpop.f32.mrb[2].mxu0 }
 0x203   :  { %v481_v4 = vpop.f32.mrb[3].mxu0  ;;  %v217_v5 = vpop.f32.mrb[0].mxu1  ;;  %v135_v38 = vmul.f32 %v547_v35, %v128_v2 }
 0x204   :  { %v226_v8 = vmul.f32 %v533_v3, %v217_v5  ;;  %v486_v9 = vpop.f32.mrb[1].mxu1 }
 0x205   :  { %v220_v11 = vpop.f32.mrb[2].mxu1 }
 0x206   :  { %v227_v12 = vmul.f32 %v535_v10, %v220_v11  ;;  %v487_v13 = vpop.f32.mrb[3].mxu1  ;;  %414 = vrot.lane.b32.xlu0 %v226_v8, %s554_s1 }
 0x208   :  { %v309_v14 = vpop.f32.mrb[4].mxu0  ;;  %416 = vrot.lane.b32.xlu1 %v227_v12, %s554_s1 }
 0x209   :  { %v492_v16 = vpop.f32.mrb[5].mxu0  ;;  %v318_v18 = vmul.f32 %v537_v15, %v309_v14 }
 0x20a   :  { %v312_v19 = vpop.f32.mrb[6].mxu0 }
 0x20b   :  { %v319_v20 = vmul.f32 %v539_v17, %v312_v19  ;;  %v493_v21 = vpop.f32.mrb[7].mxu0  ;;  %v401_v22 = vpop.f32.mrb[4].mxu1 }
 0x20c   :  { %v498_v24 = vpop.f32.mrb[5].mxu1  ;;  %422 = vrot.lane.b32.xlu1 %v318_v18, %s556_s3  ;;  %v410_v27 = vmul.f32 %v543_v25, %v401_v22 }
 0x20d   :  { %424 = vrot.lane.b32.xlu0 %v319_v20, %s556_s3  ;;  %v404_v26 = vpop.f32.mrb[6].mxu1 }
 0x20e   :  { %v411_v6 = vmul.f32 %v541_v23, %v404_v26  ;;  %v499_v28 = vpop.f32.mrb[7].mxu1 }
 0x210   :  { %430 = vrot.lane.b32.xlu1 %v410_v27, %s552_s24 }
 0x211   :  { %432 = vrot.lane.b32.xlu0 %v411_v6, %s552_s24 }
 0x278   :  { %v415_v32 = vpop.permute.xlu0 %414 }
 0x279   :  { %v437_v39 = vsel %vm436_vm14, %v134_v36, %v415_v32 }
 0x27a   :  { %v417_v31 = vpop.permute.xlu1 %416 }
 0x27b   :  { %v438_v41 = vsel %vm436_vm14, %v135_v38, %v417_v31 }
 0x27e   :  { %v423_v34 = vpop.permute.xlu1 %422 }
 0x27f   :  { %v425_v37 = vpop.permute.xlu0 %424  ;;  %v440_v42 = vsel %vm439_vm15, %v437_v39, %v423_v34 }
 0x280   :  { %v441_v44 = vsel %vm439_vm15, %v438_v41, %v425_v37 }
 0x282   :  { %v431_v43 = vpop.permute.xlu1 %430 }
 0x283   :  { %v443_v45 = vsel %vm442_vm0, %v440_v42, %v431_v43  ;;  %v433_v46 = vpop.permute.xlu0 %432 }
 0x284   :  { %v452_v47 = vadd.f32 %v467_v40, %v443_v45  ;;  %v444_v48 = vsel %vm442_vm0, %v441_v44, %v433_v46 }
 0x285   :  { %v453_v49 = vadd.f32 %v467_v40, %v444_v48 }
 0x286   :  { %v454_v50 = vmax.f32 %v452_v47, 0.0 }
 0x287   :  { %v455_v51 = vmax.f32 %v453_v49, 0.0 }
 0x288   :  { %456 = vst [vmem:[%s698_s5] sm:$0xff] %v454_v50 }
 0x289   :  { %457 = vst [vmem:[%s698_s5 + $0x8] sm:$0xff] %v455_v51 }

// kernel: enhanced_gat_forward.13
= control target key start
LH: loop header
LB: loop body
LE: loop exit
PB: predicated region body
PF: predicated region fallthrough
CT: control target
= control target key end

     0   :  { %vm37_vm0 = vcmask 1041408   ;;  %vm30_vm1 = vcmask 31744   ;;  %vm90_vm2 = vcmask 261120   ;;  %s162_s1 = inlined_call_operand.vmem [shape: f32[4,32], index: 1, kind: input, shape index: {}]   ;;  %s163_s0 = inlined_call_operand.vmem [shape: f32[32,4], index: 0, kind: input, shape index: {}]   ;;  %s164_s2 = inlined_call_operand.vmem [shape: f32[1,32], index: 2, kind: input, shape index: {}]   ;;  %s165_s3 = inlined_call_operand.vmem [shape: f32[32,32], index: 3, kind: output, shape index: {}]  }
   0x1   :  { %v21_v0 = vld [vmem:[%s162_s1] sm:$0xf]  ;;  %v16_v2 = vld [vmem:[%s163_s0 + $0x8] sm:$0xff]  ;;  %v17_v5 = vld [vmem:[%s163_s0 + $0x10] sm:$0xff] }
   0x2   :  { %v15_v1 = vld [vmem:[%s163_s0] sm:$0xff]  ;;  %v22_v3 = vpack.c.bf16 %v21_v0, %v21_v0  ;;  %v18_v6 = vld [vmem:[%s163_s0 + $0x18] sm:$0xff] }
   0x3   :  { %v19_v4 = vpack.c.bf16 %v16_v2, %v15_v1  ;;  %v20_v8 = vpack.c.bf16 %v18_v6, %v17_v5  ;;  %v99_v9 = vld [vmem:[%s164_s2] ss:$0 sm:$0xff] }
   0x4   :  { %111 = vmatprep.subr.msk.bf16.mxu0 %vm37_vm0, %v22_v3  ;;  %v39_v7 = vsel %vm37_vm0, %v22_v3, 0 }
   0x5   :  { %107 = vmatprep.mubr.msk.bf16.mxu0 %vm30_vm1, %v19_v4  ;;  %106 = vmatpush3.bf16.msra.mxu0 %v39_v7 }
   0x8   :  { %108 = vmatmul.mubr.msk.bf16.vlgmr.msra.gmra.mrb[0].mxu0 %vm30_vm1, %v20_v8 }
  0xdb   :  { %v109_v10 = vpop.f32.mrb[0].mxu0 }
  0xdc   :  { %v84_v11 = vadd.f32 %v109_v10, %v99_v9  ;;  %v75_v12 = vpop.f32.mrb[1].mxu0 }
  0xdd   :  { %v76_v13 = vadd.f32 %v99_v9, %v75_v12  ;;  %v110_v14 = vpop.f32.mrb[2].mxu0 }
  0xde   :  { %93 = vst.msk [vmem:[%s165_s3 + $0x10] sm:$0xff] %vm90_vm2, %v84_v11  ;;  %v87_v15 = vadd.f32 %v110_v14, %v99_v9  ;;  %v78_v16 = vpop.f32.mrb[3].mxu0 }
  0xdf   :  { %91 = vst.msk [vmem:[%s165_s3] sm:$0xff] %vm90_vm2, %v76_v13  ;;  %v79_v17 = vadd.f32 %v99_v9, %v78_v16 }
  0xe0   :  { %94 = vst.msk [vmem:[%s165_s3 + $0x18] sm:$0xff] %vm90_vm2, %v87_v15 }
  0xe1   :  { %92 = vst.msk [vmem:[%s165_s3 + $0x8] sm:$0xff] %vm90_vm2, %v79_v17 }

// kernel: enhanced_gat_forward.24
= control target key start
LH: loop header
LB: loop body
LE: loop exit
PB: predicated region body
PF: predicated region fallthrough
CT: control target
= control target key end

     0   :  { %v102_v0 = vmov 0.0   ;;  %vm103_vm0 = vmmov 0   ;;  %vm33_vm1 = vcmask 392192   ;;  %vm78_vm2 = vcmask 254976   ;;  %s151_s1 = inlined_call_operand.vmem [shape: f32[48,32], index: 1, kind: input, shape index: {}]   ;;  %s152_s0 = inlined_call_operand.vmem [shape: f32[2,48], index: 0, kind: input, shape index: {}]   ;;  %s153_s2 = inlined_call_operand.vmem [shape: f32[1,32], index: 2, kind: input, shape index: {}]   ;;  %s154_s3 = inlined_call_operand.vmem [shape: f32[2,32], index: 3, kind: output, shape index: {}]  }
   0x1   :  { %90 = vmatprep.subr.bf16.mxu0 %v102_v0  ;;  %v17_v1 = vld [vmem:[%s151_s1] sm:$0xff]  ;;  %v18_v2 = vld [vmem:[%s151_s1 + $0x8] sm:$0xff]  ;;  %v19_v3 = vld [vmem:[%s151_s1 + $0x10] sm:$0xff]  ;;  %96 = vmatprep.mubr.msk.bf16.mxu0 %vm103_vm0, %v102_v0 }
   0x2   :  { %v23_v4 = vpack.c.bf16 %v18_v2, %v17_v1  ;;  %v20_v5 = vld [vmem:[%s151_s1 + $0x18] sm:$0xff]  ;;  %v21_v7 = vld [vmem:[%s151_s1 + $0x20] sm:$0xff]  ;;  %v22_v8 = vld [vmem:[%s151_s1 + $0x28] sm:$0xff] }
   0x3   :  { %v24_v6 = vpack.c.bf16 %v20_v5, %v19_v3  ;;  %v25_v9 = vpack.c.bf16 %v22_v8, %v21_v7  ;;  %v15_v10 = vld [vmem:[%s152_s0] sm:$0x3] }
   0x4   :  { %91 = vmatpush3.bf16.msra.mxu0 %v23_v4  ;;  %v16_v11 = vpack.c.bf16 %v15_v10, %v15_v10  ;;  %v84_v12 = vld [vmem:[%s153_s2] ss:$0 sm:$0xff] }
   0x5   :  { %92 = vmatprep.subr.bf16.mxu0 %v102_v0 }
   0x8   :  { %93 = vmatpush3.bf16.msra.mxu0 %v24_v6 }
   0x9   :  { %94 = vmatprep.subr.bf16.mxu0 %v102_v0 }
   0xc   :  { %95 = vmatpush3.bf16.msra.mxu0 %v25_v9 }
   0xf   :  { %97 = vmatmul.mubr.msk.bf16.vlgmr.msra.gmra.mrb[0].mxu0 %vm33_vm1, %v16_v11 }
  0xe2   :  { %v71_v13 = vpop.f32.mrb[0].mxu0 }
  0xe3   :  { %v72_v14 = vadd.f32 %v84_v12, %v71_v13  ;;  %v98_v15 = vpop.f32.mrb[1].mxu0 }
  0xe4   :  { %v74_v16 = vpop.f32.mrb[2].mxu0 }
  0xe5   :  { %v77_v17 = vmax.f32 %v72_v14, 0.0  ;;  %v99_v18 = vpop.f32.mrb[3].mxu0 }
  0xe7   :  { %79 = vst.msk [vmem:[%s154_s3] sm:$0x3] %vm78_vm2, %v77_v17 }

// kernel: enhanced_gat_forward.17
= control target key start
LH: loop header
LB: loop body
LE: loop exit
PB: predicated region body
PF: predicated region fallthrough
CT: control target
= control target key end

     0   :  { %v433_v0 = vmov 0.0   ;;  %vm434_vm0 = vmmov 0   ;;  %vm274_vm1 = vcmask 31744   ;;  %vm264_vm2 = vcmask 125952   ;;  %s553_s1 = inlined_call_operand.vmem [shape: bf16[128,128], index: 1, kind: input, shape index: {}]   ;;  %s554_s2 = inlined_call_operand.vmem [shape: f32[128,8], index: 2, kind: input, shape index: {}]   ;;  %s555_s0 = inlined_call_operand.vmem [shape: bf16[16,128], index: 0, kind: input, shape index: {}]   ;;  %s556_s3 = inlined_call_operand.vmem [shape: bf16[16,128], index: 3, kind: output, shape index: {0}]   ;;  %s557_s5 = inlined_call_operand.vmem [shape: f32[16,4], index: 5, kind: output, shape index: {2}]   ;;  %s558_s4 = inlined_call_operand.vmem [shape: f32[4,16], index: 4, kind: output, shape index: {1}]  }
   0x1   :  { %334 = vmatprep.subr.bf16.mxu0 %v433_v0  ;;  %v424_v1 = vld [vmem:[%s553_s1] sm:$0xff]   ;;  %350 = vmatprep.mubr.msk.bf16.mxu0 %vm434_vm0, %v433_v0  ;;  %v425_v2 = vld [vmem:[%s553_s1 + $0x8] sm:$0xff]   ;;  %v426_v3 = vld [vmem:[%s553_s1 + $0x10] sm:$0xff]  }
   0x2   :  { %335 = vmatpush3.bf16.msra.mxu0 %v424_v1  ;;  %v131_v4 = vld [vmem:[%s554_s2] sm:$0xff]  ;;  %v132_v5 = vld [vmem:[%s554_s2 + $0x8] sm:$0xff]  ;;  %v133_v6 = vld [vmem:[%s554_s2 + $0x10] sm:$0xff] }
   0x3   :  { %336 = vmatprep.subr.bf16.mxu0 %v433_v0  ;;  %v427_v7 = vld [vmem:[%s553_s1 + $0x18] sm:$0xff]   ;;  %v389_v8 = vpack.c.bf16 %v132_v5, %v131_v4  ;;  %v135_v11 = vld [vmem:[%s554_s2 + $0x20] sm:$0xff]  ;;  %v136_v12 = vld [vmem:[%s554_s2 + $0x28] sm:$0xff] }
   0x4   :  { %v134_v9 = vld [vmem:[%s554_s2 + $0x18] sm:$0xff]  ;;  %v428_v13 = vld [vmem:[%s553_s1 + $0x20] sm:$0xff]   ;;  %v397_v14 = vpack.c.bf16 %v136_v12, %v135_v11  ;;  %v137_v15 = vld [vmem:[%s554_s2 + $0x30] sm:$0xff] }
   0x5   :  { %v393_v10 = vpack.c.bf16 %v134_v9, %v133_v6  ;;  %390 = vmatprep.subr.bf16.mxu1 %v389_v8  ;;  %v138_v16 = vld [vmem:[%s554_s2 + $0x38] sm:$0xff]  ;;  %v429_v17 = vld [vmem:[%s553_s1 + $0x28] sm:$0xff]   ;;  %v139_v19 = vld [vmem:[%s554_s2 + $0x40] sm:$0xff] }
   0x6   :  { %337 = vmatpush3.bf16.msra.mxu0 %v425_v2  ;;  %392 = vmatpush3.bf16.msra.mxu1 %v389_v8  ;;  %v401_v18 = vpack.c.bf16 %v138_v16, %v137_v15  ;;  %v140_v20 = vld [vmem:[%s554_s2 + $0x48] sm:$0xff]  ;;  %v430_v21 = vld [vmem:[%s553_s1 + $0x30] sm:$0xff]   ;;  %v142_v24 = vld [vmem:[%s554_s2 + $0x58] sm:$0xff] }
   0x7   :  { %338 = vmatprep.subr.bf16.mxu0 %v433_v0  ;;  %394 = vmatprep.subr.bf16.mxu1 %v393_v10  ;;  %v405_v22 = vpack.c.bf16 %v140_v20, %v139_v19  ;;  %v141_v23 = vld [vmem:[%s554_s2 + $0x50] sm:$0xff]  ;;  %v431_v25 = vld [vmem:[%s553_s1 + $0x38] sm:$0xff]   ;;  %v143_v27 = vld [vmem:[%s554_s2 + $0x60] sm:$0xff] }
   0x8   :  { %v409_v26 = vpack.c.bf16 %v142_v24, %v141_v23  ;;  %v144_v28 = vld [vmem:[%s554_s2 + $0x68] sm:$0xff]  ;;  %v432_v29 = vld [vmem:[%s555_s0] sm:$0xff]   ;;  %v145_v31 = vld [vmem:[%s554_s2 + $0x70] sm:$0xff] }
   0x9   :  { %v413_v30 = vpack.c.bf16 %v144_v28, %v143_v27  ;;  %v146_v32 = vld [vmem:[%s554_s2 + $0x78] sm:$0xff]  ;;  %s435_s2 = smov 124  }
   0xa   :  { %339 = vmatpush3.bf16.msra.mxu0 %v426_v3  ;;  %396 = vmatpush3.bf16.msra.mxu1 %v393_v10  ;;  %v417_v33 = vpack.c.bf16 %v146_v32, %v145_v31 }
   0xb   :  { %340 = vmatprep.subr.bf16.mxu0 %v433_v0  ;;  %398 = vmatprep.subr.bf16.mxu1 %v397_v14 }
   0xe   :  { %341 = vmatpush3.bf16.msra.mxu0 %v427_v7  ;;  %400 = vmatpush3.bf16.msra.mxu1 %v397_v14 }
   0xf   :  { %342 = vmatprep.subr.bf16.mxu0 %v433_v0  ;;  %402 = vmatprep.subr.bf16.mxu1 %v401_v18 }
  0x12   :  { %343 = vmatpush3.bf16.msra.mxu0 %v428_v13  ;;  %404 = vmatpush3.bf16.msra.mxu1 %v401_v18 }
  0x13   :  { %344 = vmatprep.subr.bf16.mxu0 %v433_v0  ;;  %406 = vmatprep.subr.bf16.mxu1 %v405_v22 }
  0x16   :  { %345 = vmatpush3.bf16.msra.mxu0 %v429_v17  ;;  %408 = vmatpush3.bf16.msra.mxu1 %v405_v22 }
  0x17   :  { %346 = vmatprep.subr.bf16.mxu0 %v433_v0  ;;  %410 = vmatprep.subr.bf16.mxu1 %v409_v26 }
  0x1a   :  { %347 = vmatpush3.bf16.msra.mxu0 %v430_v21  ;;  %412 = vmatpush3.bf16.msra.mxu1 %v409_v26 }
  0x1b   :  { %348 = vmatprep.subr.bf16.mxu0 %v433_v0  ;;  %414 = vmatprep.subr.bf16.mxu1 %v413_v30 }
  0x1e   :  { %349 = vmatpush3.bf16.msra.mxu0 %v431_v25  ;;  %416 = vmatpush3.bf16.msra.mxu1 %v413_v30 }
  0x1f   :  { %418 = vmatprep.subr.bf16.mxu1 %v417_v33 }
  0x21   :  { %351 = vmatmul.mubr.bf16.vlgmr.msra.gmra.mrb[0].mxu0 %v432_v29 }
  0x22   :  { %420 = vmatpush3.bf16.msra.mxu1 %v417_v33 }
  0xf4   :  { %v124_v34 = vpop.f32.mrb[0].mxu0 }
  0xf5   :  { %v352_v35 = vpop.f32.mrb[1].mxu0  ;;  %386 = vmatprep.mubr.f32.mxu1 %v124_v34 }
  0xf6   :  { %v127_v36 = vpop.f32.mrb[2].mxu0 }
  0xf7   :  { %v305_v37 = vpack.c.bf16 %v127_v36, %v124_v34  ;;  %v353_v38 = vpop.f32.mrb[3].mxu0  ;;  %387 = vmatmul.mubr.f32.vlgmr.msra.gmra.mrb[0].mxu1 %v127_v36 }
  0xf9   :  { %306 = vst [vmem:[%s556_s3] sm:$0xff] %v305_v37  }
 0x1ca   :  { %v388_v39 = vpop.f32.mrb[0].mxu1 }
 0x1cb   :  { %v213_v40 = vpop.f32.mrb[1].mxu1 }
 0x1cc   :  { %232 = vxpose.xlu1.b32.start [1/2] (short) (narrow) %v213_v40, 8  ;;  %268 = vrot.lane.b32.xlu0 %v213_v40, %s435_s2 }
 0x1d0   :  { %233 = vxpose.xlu1.b32.end [2/2] (short) (narrow) %v388_v39, 8  ;;  %270 = vrot.lane.b32.xlu0 %v388_v39, %s435_s2 }
 0x23e   :  { %v269_v41 = vpop.permute.xlu0 %268 }
 0x23f   :  { %275 = vst.msk [vmem:[%s557_s5] sm:$0xff] %vm274_vm1, %v269_v41 }
 0x242   :  { %v271_v42 = vpop.permute.xlu0 %270 }
 0x243   :  { %276 = vst.msk [vmem:[%s557_s5 + $0x8] sm:$0xff] %vm274_vm1, %v271_v42 }
 0x24c   :  { %v248_v43 = vpop.trf.xlu1 }
 0x24d   :  { %265 = vst.msk [vmem:[%s558_s4] sm:$0xf] %vm264_vm2, %v248_v43 }

// kernel: enhanced_gat_forward.14
= control target key start
LH: loop header
LB: loop body
LE: loop exit
PB: predicated region body
PF: predicated region fallthrough
CT: control target
= control target key end

     0   :  { %v146_v0 = vmov 0.0   ;;  %vm147_vm0 = vmmov 0   ;;  %vm37_vm1 = vcmask 261120   ;;  %vm104_vm2 = vcmask 72704   ;;  %s228_s1 = inlined_call_operand.vmem [shape: f32[32,9], index: 1, kind: input, shape index: {}]   ;;  %s229_s0 = inlined_call_operand.vmem [shape: f32[48,32], index: 0, kind: input, shape index: {}]   ;;  %s230_s2 = inlined_call_operand.vmem [shape: f32[1,9], index: 2, kind: input, shape index: {}]   ;;  %s231_s3 = inlined_call_operand.vmem [shape: f32[48,9], index: 3, kind: output, shape index: {}]  }
   0x1   :  { %140 = vmatprep.subr.bf16.mxu1 %v146_v0  ;;  %v24_v1 = vld [vmem:[%s228_s1] sm:$0xff]  ;;  %v25_v2 = vld [vmem:[%s228_s1 + $0x8] sm:$0xff]  ;;  %124 = vmatprep.subr.bf16.mxu0 %v146_v0  ;;  %v26_v3 = vld [vmem:[%s228_s1 + $0x10] sm:$0xff] }
   0x2   :  { %v28_v4 = vpack.c.bf16 %v25_v2, %v24_v1  ;;  %v27_v5 = vld [vmem:[%s228_s1 + $0x18] sm:$0xff]  ;;  %132 = vmatprep.mubr.msk.bf16.mxu1 %vm147_vm0, %v146_v0  ;;  %128 = vmatprep.mubr.msk.bf16.mxu0 %vm147_vm0, %v146_v0  ;;  %v17_v6 = vld [vmem:[%s229_s0 + $0x10] sm:$0xff]  ;;  %v15_v9 = vld [vmem:[%s229_s0] sm:$0xff] }
   0x3   :  { %v29_v7 = vpack.c.bf16 %v27_v5, %v26_v3  ;;  %v18_v8 = vld [vmem:[%s229_s0 + $0x18] sm:$0xff]  ;;  %v16_v10 = vld [vmem:[%s229_s0 + $0x8] sm:$0xff]  ;;  %v19_v13 = vld [vmem:[%s229_s0 + $0x20] sm:$0xff] }
   0x4   :  { %142 = vmatpush3.bf16.msra.mxu1 %v28_v4  ;;  %125 = vmatpush3.bf16.msra.mxu0 %v28_v4  ;;  %v22_v11 = vpack.c.bf16 %v18_v8, %v17_v6  ;;  %v21_v12 = vpack.c.bf16 %v16_v10, %v15_v9  ;;  %v20_v14 = vld [vmem:[%s229_s0 + $0x28] sm:$0xff]  ;;  %v115_v16 = vld [vmem:[%s230_s2] ss:$0 sm:$0xff] }
   0x5   :  { %141 = vmatprep.subr.bf16.mxu1 %v146_v0  ;;  %126 = vmatprep.subr.bf16.mxu0 %v146_v0  ;;  %v23_v15 = vpack.c.bf16 %v20_v14, %v19_v13 }
   0x8   :  { %143 = vmatpush3.bf16.msra.mxu1 %v29_v7  ;;  %127 = vmatpush3.bf16.msra.mxu0 %v29_v7 }
   0xb   :  { %133 = vmatmul.mubr.msk.bf16.vlgmr.msra.gmra.mrb[0].mxu1 %vm37_vm1, %v22_v11  ;;  %129 = vmatmul.mubr.msk.bf16.vlgmr.msra.gmra.mrb[0].mxu0 %vm37_vm1, %v21_v12 }
   0xc   :  { %136 = vmatprep.mubr.msk.bf16.mxu1 %vm147_vm0, %v146_v0 }
  0x13   :  { %137 = vmatmul.mubr.msk.bf16.gmra.mrb[4].mxu1 %vm37_vm1, %v23_v15 }
  0xde   :  { %v89_v17 = vpop.f32.mrb[0].mxu1  ;;  %v81_v18 = vpop.f32.mrb[0].mxu0 }
  0xdf   :  { %v90_v19 = vadd.f32 %v115_v16, %v89_v17  ;;  %v134_v20 = vpop.f32.mrb[1].mxu1  ;;  %v82_v21 = vadd.f32 %v115_v16, %v81_v18  ;;  %v130_v22 = vpop.f32.mrb[1].mxu0 }
  0xe0   :  { %v92_v23 = vpop.f32.mrb[2].mxu1  ;;  %v84_v24 = vpop.f32.mrb[2].mxu0 }
  0xe1   :  { %107 = vst.msk [vmem:[%s231_s3 + $0x10] sm:$0xff] %vm104_vm2, %v90_v19  ;;  %v93_v25 = vadd.f32 %v115_v16, %v92_v23  ;;  %v135_v26 = vpop.f32.mrb[3].mxu1  ;;  %105 = vst.msk [vmem:[%s231_s3] sm:$0xff] %vm104_vm2, %v82_v21  ;;  %v85_v27 = vadd.f32 %v115_v16, %v84_v24  ;;  %v131_v28 = vpop.f32.mrb[3].mxu0 }
  0xe3   :  { %108 = vst.msk [vmem:[%s231_s3 + $0x18] sm:$0xff] %vm104_vm2, %v93_v25  ;;  %106 = vst.msk [vmem:[%s231_s3 + $0x8] sm:$0xff] %vm104_vm2, %v85_v27 }
  0xe6   :  { %v97_v29 = vpop.f32.mrb[4].mxu1 }
  0xe7   :  { %v98_v30 = vadd.f32 %v115_v16, %v97_v29  ;;  %v138_v31 = vpop.f32.mrb[5].mxu1 }
  0xe8   :  { %v100_v32 = vpop.f32.mrb[6].mxu1 }
  0xe9   :  { %109 = vst.msk [vmem:[%s231_s3 + $0x20] sm:$0xff] %vm104_vm2, %v98_v30  ;;  %v101_v33 = vadd.f32 %v115_v16, %v100_v32  ;;  %v139_v34 = vpop.f32.mrb[7].mxu1 }
  0xeb   :  { %110 = vst.msk [vmem:[%s231_s3 + $0x28] sm:$0xff] %vm104_vm2, %v101_v33 }

// kernel: enhanced_gat_forward.21
= control target key start
LH: loop header
LB: loop body
LE: loop exit
PB: predicated region body
PF: predicated region fallthrough
CT: control target
= control target key end

     0   :  { %v366_v0 = vmov 0.0   ;;  %vm367_vm0 = vmmov 0   ;;  %vm135_vm1 = vcmask 261120   ;;  %vm225_vm2 = vcmask 257024   ;;  %s453_s1 = inlined_call_operand.vmem [shape: bf16[128,32], index: 1, kind: input, shape index: {}]   ;;  %s454_s2 = inlined_call_operand.vmem [shape: f32[32,2], index: 2, kind: input, shape index: {}]   ;;  %s455_s0 = inlined_call_operand.vmem [shape: bf16[16,128], index: 0, kind: input, shape index: {}]   ;;  %s456_s3 = inlined_call_operand.vmem [shape: bf16[16,32], index: 3, kind: output, shape index: {0}]   ;;  %s457_s5 = inlined_call_operand.vmem [shape: f32[16,1], index: 5, kind: output, shape index: {2}]   ;;  %s458_s4 = inlined_call_operand.vmem [shape: f32[1,16], index: 4, kind: output, shape index: {1}]  }
   0x1   :  { %315 = vmatprep.subr.bf16.mxu0 %v366_v0  ;;  %v357_v1 = vld [vmem:[%s453_s1] sm:$0xff]   ;;  %331 = vmatprep.mubr.msk.bf16.mxu0 %vm367_vm0, %v366_v0  ;;  %v358_v2 = vld [vmem:[%s453_s1 + $0x8] sm:$0xff]   ;;  %v359_v3 = vld [vmem:[%s453_s1 + $0x10] sm:$0xff]   ;;  %vm270_vm3 = vcmask 7168   ;;  %vm260_vm4 = vcmask 122880  }
   0x2   :  { %316 = vmatpush3.bf16.msra.mxu0 %v357_v1  ;;  %v131_v4 = vld [vmem:[%s454_s2] sm:$0xff]  ;;  %v132_v5 = vld [vmem:[%s454_s2 + $0x8] sm:$0xff]  ;;  %v133_v6 = vld [vmem:[%s454_s2 + $0x10] sm:$0xff] }
   0x3   :  { %317 = vmatprep.subr.bf16.mxu0 %v366_v0  ;;  %v360_v7 = vld [vmem:[%s453_s1 + $0x18] sm:$0xff]   ;;  %v346_v8 = vpack.c.bf16 %v132_v5, %v131_v4  ;;  %v361_v11 = vld [vmem:[%s453_s1 + $0x20] sm:$0xff]   ;;  %v362_v12 = vld [vmem:[%s453_s1 + $0x28] sm:$0xff]  }
   0x4   :  { %v134_v9 = vld [vmem:[%s454_s2 + $0x18] sm:$0xff]  ;;  %v363_v13 = vld [vmem:[%s453_s1 + $0x30] sm:$0xff]   ;;  %v365_v15 = vld [vmem:[%s455_s0] sm:$0xff]   ;;  %s368_s0 = smov 127  }
   0x5   :  { %v350_v10 = vpack.c.bf16 %v134_v9, %v133_v6  ;;  %347 = vmatprep.subr.bf16.mxu1 %v346_v8  ;;  %v364_v14 = vld [vmem:[%s453_s1 + $0x38] sm:$0xff]  }
   0x6   :  { %318 = vmatpush3.bf16.msra.mxu0 %v358_v2  ;;  %349 = vmatpush3.bf16.msra.mxu1 %v346_v8 }
   0x7   :  { %319 = vmatprep.subr.bf16.mxu0 %v366_v0  ;;  %351 = vmatprep.subr.bf16.mxu1 %v350_v10 }
   0xa   :  { %320 = vmatpush3.bf16.msra.mxu0 %v359_v3  ;;  %353 = vmatpush3.bf16.msra.mxu1 %v350_v10 }
   0xb   :  { %321 = vmatprep.subr.bf16.mxu0 %v366_v0 }
   0xe   :  { %322 = vmatpush3.bf16.msra.mxu0 %v360_v7 }
   0xf   :  { %323 = vmatprep.subr.bf16.mxu0 %v366_v0 }
  0x12   :  { %324 = vmatpush3.bf16.msra.mxu0 %v361_v11 }
  0x13   :  { %325 = vmatprep.subr.bf16.mxu0 %v366_v0 }
  0x16   :  { %326 = vmatpush3.bf16.msra.mxu0 %v362_v12 }
  0x17   :  { %327 = vmatprep.subr.bf16.mxu0 %v366_v0 }
  0x1a   :  { %328 = vmatpush3.bf16.msra.mxu0 %v363_v13 }
  0x1b   :  { %329 = vmatprep.subr.bf16.mxu0 %v366_v0 }
  0x1e   :  { %330 = vmatpush3.bf16.msra.mxu0 %v364_v14 }
  0x21   :  { %332 = vmatmul.mubr.bf16.vlgmr.msra.gmra.mrb[0].mxu0 %v365_v15 }
  0xf4   :  { %v124_v16 = vpop.f32.mrb[0].mxu0 }
  0xf5   :  { %v298_v17 = vpack.c.bf16 %v124_v16, %v124_v16  ;;  %v333_v18 = vpop.f32.mrb[1].mxu0  ;;  %343 = vmatprep.mubr.msk.f32.mxu1 %vm135_vm1, %v124_v16 }
  0xf6   :  { %v127_v19 = vpop.f32.mrb[2].mxu0 }
  0xf7   :  { %226 = vst.msk [vmem:[%s456_s3] sm:$0xf] %vm225_vm2, %v298_v17  ;;  %v299_v20 = vpack.c.bf16 %v127_v19, %v127_v19  ;;  %v334_v21 = vpop.f32.mrb[3].mxu0  ;;  %344 = vmatmul.mubr.msk.f32.vlgmr.msra.gmra.mrb[0].mxu1 %vm135_vm1, %v127_v19 }
  0xf9   :  { %227 = vst.msk [vmem:[%s456_s3 + $0x4] sm:$0xf] %vm225_vm2, %v299_v20 }
 0x1ca   :  { %v345_v22 = vpop.f32.mrb[0].mxu1 }
 0x1cb   :  { %v208_v23 = vpop.f32.mrb[1].mxu1 }
 0x1cc   :  { %228 = vxpose.xlu1.b32.start [1/2] (short) (narrow) %v208_v23, 8  ;;  %264 = vrot.lane.b32.xlu0 %v208_v23, %s368_s0 }
 0x1d0   :  { %229 = vxpose.xlu1.b32.end [2/2] (short) (narrow) %v345_v22, 8  ;;  %266 = vrot.lane.b32.xlu0 %v345_v22, %s368_s0 }
 0x23e   :  { %v265_v24 = vpop.permute.xlu0 %264 }
 0x23f   :  { %271 = vst.msk [vmem:[%s457_s5] sm:$0xff] %vm270_vm3, %v265_v24 }
 0x242   :  { %v267_v25 = vpop.permute.xlu0 %266 }
 0x243   :  { %272 = vst.msk [vmem:[%s457_s5 + $0x8] sm:$0xff] %vm270_vm3, %v267_v25 }
 0x24c   :  { %v244_v26 = vpop.trf.xlu1 }
 0x24d   :  { %261 = vst.msk [vmem:[%s458_s4] sm:$0x1] %vm260_vm4, %v244_v26 }

// kernel: enhanced_gat_forward.22
= control target key start
LH: loop header
LB: loop body
LE: loop exit
PB: predicated region body
PF: predicated region fallthrough
CT: control target
= control target key end

     0   :  { %v192_v0 = vmov 0   ;;  %vm73_vm4 = vcmask 130048   ;;  %v193_v28 = vmov 0.0   ;;  %vm194_vm7 = vmmov 0   ;;  %s265_s0 = inlined_call_operand.vmem [shape: f32[16,1], index: 0, kind: input, shape index: {}]   ;;  %s266_s3 = inlined_call_operand.vmem [shape: bf16[16,16], index: 3, kind: input, shape index: {}]   ;;  %s267_s5 = inlined_call_operand.vmem [shape: bf16[1,16,16], index: 5, kind: input, shape index: {}]   ;;  %s268_s1 = inlined_call_operand.vmem [shape: f32[1,16], index: 1, kind: input, shape index: {}]   ;;  %s269_s2 = inlined_call_operand.vmem [shape: bf16[16,32], index: 2, kind: input, shape index: {}]   ;;  %s270_s4 = inlined_call_operand.vmem [shape: f32[1,32], index: 4, kind: input, shape index: {}]   ;;  %s271_s6 = inlined_call_operand.vmem [shape: f32[16,32], index: 6, kind: output, shape index: {}]  }
   0x1   :  { %182 = vset.pattern.permute.xlu0 %v192_v0  ;;  %v26_v1 = vld [vmem:[%s265_s0] sm:$0xff]  ;;  %v27_v2 = vld [vmem:[%s265_s0 + $0x8] sm:$0xff]  ;;  %173 = vmatprep.subr.bf16.mxu0 %v193_v28  ;;  %vm156_vm8 = vcmask 261120  }
   0x2   :  { %37 = vperm.xlu0 %182, %v26_v1   ;;  %v31_v3 = vld [vmem:[%s266_s3] sm:$0xf]  ;;  %v32_v5 = vld [vmem:[%s266_s3 + $0x4] sm:$0xf]  ;;  %175 = vmatprep.mubr.msk.bf16.mxu0 %vm194_vm7, %v193_v28 }
   0x3   :  { %vm33_vm0 = vcmp.gt.bf16.partialorder %v31_v3, 0  ;;  %v168_v4 = vld [vmem:[%s267_s5] sm:$0xff]   ;;  %vm34_vm1 = vcmp.gt.bf16.partialorder %v32_v5, 0 }
   0x4   :  { %v65_v6 = vsel %vm33_vm0, 65537, %v192_v0  ;;  %v163_v7 = vld [vmem:[%s268_s1] ss:$0 sm:$0xff]  ;;  %v169_v8 = vunpack.c.l.bf16 %v168_v4  ;;  %v66_v12 = vsel %vm34_vm1, 65537, %v192_v0  ;;  %v170_v14 = vunpack.c.h.bf16 %v168_v4 }
   0x5   :  { %v67_v10 = vunpack.c.l.b16 %v65_v6  ;;  %v68_v18 = vunpack.c.l.b16 %v66_v12  ;;  %v183_v27 = vld [vmem:[%s269_s2] sm:$0xff]  }
   0x6   :  { %42 = vperm.xlu0 %182, %v27_v2   ;;  %174 = vmatpush3.bf16.msra.mxu0 %v183_v27  ;;  %v166_v44 = vld [vmem:[%s270_s4] ss:$0 sm:$0xff] }
   0x7   :  { %vm69_vm2 = vcmp.ne.s32.totalorder %v67_v10, 0  ;;  %vm70_vm6 = vcmp.ne.s32.totalorder %v68_v18, 0 }
  0x81   :  { %v38_v9 = vpop.permute.xlu0 %37 }
  0x82   :  { %v51_v11 = vadd.f32 %v163_v7, %v38_v9 }
  0x84   :  { %v57_v13 = vadd.f32 %v169_v8, %v51_v11 }
  0x85   :  { %v43_v15 = vpop.permute.xlu0 %42 }
  0x86   :  { %v52_v16 = vadd.f32 %v163_v7, %v43_v15  ;;  %vm59_vm3 = vcmp.gt.f32.partialorder %v57_v13, 0.0  ;;  %v61_v17 = vmul.f32 0.2, %v57_v13 }
  0x88   :  { %v58_v19 = vadd.f32 %v170_v14, %v52_v16  ;;  %v63_v20 = vsel %vm59_vm3, %v57_v13, %v61_v17 }
  0x89   :  { %v71_v21 = vsel %vm69_vm2, %v63_v20, -1e+30 }
  0x8a   :  { %v74_v22 = vsel %vm73_vm4, %v71_v21, -inf  ;;  %vm60_vm5 = vcmp.gt.f32.partialorder %v58_v19, 0.0  ;;  %v62_v23 = vmul.f32 0.2, %v58_v19 }
  0x8b   :  { %75 = vmax.xlane.f32.xlu1 %v74_v22 }
  0x8c   :  { %v64_v24 = vsel %vm60_vm5, %v58_v19, %v62_v23 }
  0x8d   :  { %v72_v25 = vsel %vm70_vm6, %v64_v24, -1e+30 }
  0x8e   :  { %v77_v26 = vsel %vm73_vm4, %v72_v25, -inf }
  0x8f   :  { %78 = vmax.xlane.f32.xlu1 %v77_v26 }
 0x118   :  { %v76_v29 = vpop.xlane.xlu1 %75 }
 0x119   :  { %v80_v30 = vsub.f32 %v71_v21, %v76_v29 }
 0x11b   :  { %v82_v31 = vmul.f32 1.442695, %v80_v30 }
 0x11c   :  { %v79_v32 = vpop.xlane.xlu1 %78 }
 0x11d   :  { %184 = vpow2.f32 %v82_v31  ;;  %v81_v33 = vsub.f32 %v72_v25, %v79_v32 }
 0x11f   :  { %v84_v34 = vmul.f32 1.442695, %v81_v33 }
 0x121   :  { %186 = vpow2.f32 %v84_v34 }
 0x127   :  { %v185_v35 = vpop.eup %184 }
 0x128   :  { %v86_v36 = vsel %vm73_vm4, %v185_v35, 0.0 }
 0x129   :  { %87 = vadd.xlane.f32.xlu0 %v86_v36 }
 0x12b   :  { %v187_v37 = vpop.eup %186 }
 0x12c   :  { %v89_v38 = vsel %vm73_vm4, %v187_v37, 0.0  ;;  %v92_v39 = vpack.c.bf16 %v187_v37, %v185_v35 }
 0x12d   :  { %90 = vadd.xlane.f32.xlu1 %v89_v38 }
 0x12e   :  { %176 = vmatmul.mubr.msk.bf16.vlgmr.msra.gmra.mrb[0].mxu0 %vm73_vm4, %v92_v39 }
 0x1b6   :  { %v88_v40 = vpop.xlane.xlu0 %87 }
 0x1b7   :  { %188 = vrcp.f32 %v88_v40 }
 0x1ba   :  { %v91_v41 = vpop.xlane.xlu1 %90 }
 0x1bb   :  { %190 = vrcp.f32 %v91_v41 }
 0x1c1   :  { %v189_v42 = vpop.eup %188 }
 0x1c5   :  { %v191_v47 = vpop.eup %190 }
 0x201   :  { %v136_v43 = vpop.f32.mrb[0].mxu0 }
 0x202   :  { %v145_v45 = vmul.f32 %v189_v42, %v136_v43  ;;  %v177_v46 = vpop.f32.mrb[1].mxu0 }
 0x203   :  { %v139_v48 = vpop.f32.mrb[2].mxu0 }
 0x204   :  { %v154_v49 = vadd.f32 %v166_v44, %v145_v45  ;;  %v146_v50 = vmul.f32 %v191_v47, %v139_v48  ;;  %v178_v51 = vpop.f32.mrb[3].mxu0 }
 0x206   :  { %157 = vst.msk [vmem:[%s271_s6] sm:$0xff] %vm156_vm8, %v154_v49  ;;  %v155_v52 = vadd.f32 %v166_v44, %v146_v50 }
 0x208   :  { %158 = vst.msk [vmem:[%s271_s6 + $0x8] sm:$0xff] %vm156_vm8, %v155_v52 }

// kernel: enhanced_gat_forward.18
= control target key start
LH: loop header
LB: loop body
LE: loop exit
PB: predicated region body
PF: predicated region fallthrough
CT: control target
= control target key end

     0   :  { %v603_v0 = vmov 1   ;;  %v604_v1 = vmov 0   ;;  %v605_v4 = vmov 2   ;;  %v606_v5 = vmov 3   ;;  %s607_s27 = smov 96   ;;  %s611_s14 = smov 64   ;;  %s765_s0 = inlined_call_operand.vmem [shape: f32[16,4], index: 0, kind: input, shape index: {}]   ;;  %s766_s2 = inlined_call_operand.vmem [shape: bf16[16,128], index: 2, kind: input, shape index: {}]   ;;  %s767_s3 = inlined_call_operand.vmem [shape: bf16[16,16], index: 3, kind: input, shape index: {}]   ;;  %s768_s1 = inlined_call_operand.vmem [shape: f32[4,16], index: 1, kind: input, shape index: {}]   ;;  %s769_s5 = inlined_call_operand.vmem [shape: bf16[4,16,16], index: 5, kind: input, shape index: {}]   ;;  %s770_s4 = inlined_call_operand.vmem [shape: f32[1,128], index: 4, kind: input, shape index: {}]   ;;  %s771_s6 = inlined_call_operand.vmem [shape: f32[16,128], index: 6, kind: output, shape index: {}]  }
   0x1   :  { %565 = vset.pattern.permute.xlu1 %v603_v0  ;;  %564 = vset.pattern.permute.xlu0 %v604_v1  ;;  %v26_v2 = vld [vmem:[%s765_s0] sm:$0xff]  ;;  %v27_v3 = vld [vmem:[%s765_s0 + $0x8] sm:$0xff]  ;;  %v608_v7 = vmov 0.0   ;;  %v45_v8 = vlaneseq  ;;  %v521_v39 = vld [vmem:[%s769_s5 + $0x10] sm:$0xff]   ;;  %vm71_vm4 = vcmask 130048   ;;  %vm610_vm13 = vmmov 0  }
   0x2   :  { %146 = vperm.xlu1 %565, %v26_v2   ;;  %37 = vperm.xlu0 %564, %v26_v2   ;;  %v656_v6 = vld [vmem:[%s766_s2] sm:$0xff]   ;;  %v520_v15 = vld [vmem:[%s769_s5 + $0x8] sm:$0xff]   ;;  %v515_v47 = vunpack.c.h.bf16 %v521_v39  ;;  %v514_v48 = vunpack.c.l.bf16 %v521_v39  ;;  %v522_v55 = vld [vmem:[%s769_s5 + $0x18] sm:$0xff]   ;;  %vm466_vm14 = vcmask 261120   ;;  %vm469_vm15 = vcmask 523264  }
   0x3   :  { %537 = vmatprep.subr.bf16.mxu1 %v608_v7  ;;  %531 = vmatprep.subr.bf16.mxu0 %v608_v7  ;;  %v46_v9 = vshrl.u32 %v45_v8, 7  ;;  %v31_v10 = vld [vmem:[%s767_s3] sm:$0xf]  ;;  %v32_v14 = vld [vmem:[%s767_s3 + $0x4] sm:$0xf]  ;;  %v510_v20 = vunpack.c.l.bf16 %v520_v15  ;;  %v511_v31 = vunpack.c.h.bf16 %v520_v15 }
   0x4   :  { %532 = vmatpush3.bf16.msra.mxu0 %v656_v6  ;;  %vm33_vm0 = vcmp.gt.bf16.partialorder %v31_v10, 0  ;;  %v28_v13 = vld [vmem:[%s768_s1] sm:$0xf]  ;;  %vm34_vm1 = vcmp.gt.bf16.partialorder %v32_v14, 0  ;;  %533 = vmatprep.mubr.msk.bf16.mxu0 %vm610_vm13, %v608_v7 }
   0x5   :  { %543 = vmatprep.subr.bf16.mxu0 %v608_v7  ;;  %v155_v11 = vsub.s32 1, %v46_v9  ;;  %v47_v12 = vsub.s32 0, %v46_v9  ;;  %v505_v16 = vld [vmem:[%s769_s5] sm:$0xff]   ;;  %v63_v17 = vsel %vm33_vm0, 65537, %v604_v1  ;;  %v64_v25 = vsel %vm34_vm1, 65537, %v604_v1  ;;  %s609_s5 = smov 32   ;;  %539 = vmatprep.mubr.msk.bf16.mxu1 %vm610_vm13, %v608_v7 }
   0x6   :  { %150 = vperm.xlu1 %565, %v27_v3   ;;  %42 = vperm.xlu0 %564, %v27_v3   ;;  %v506_v21 = vunpack.c.l.bf16 %v505_v16  ;;  %v65_v22 = vunpack.c.l.b16 %v63_v17  ;;  %v254_v28 = vsub.s32 2, %v46_v9  ;;  %v507_v32 = vunpack.c.h.bf16 %v505_v16 }
   0x7   :  { %v156_v18 = vrot.slane %v28_v13, %v155_v11  ;;  %v48_v19 = vrot.slane %v28_v13, %v47_v12  ;;  %v66_v33 = vunpack.c.l.b16 %v64_v25  ;;  %v353_v46 = vsub.s32 3, %v46_v9 }
   0x8   :  { %vm679_vm2 = vcmp.ne.s32.totalorder %v65_v22, 0  ;;  %v255_v41 = vrot.slane %v28_v13, %v254_v28  ;;  %v518_v1 = vunpack.c.l.bf16 %v522_v55  ;;  %vm472_vm0 = vcmask 785408  }
   0x9   :  { %vm690_vm6 = vcmp.ne.s32.totalorder %v66_v33, 0  ;;  %v354_v60 = vrot.slane %v28_v13, %v353_v46 }
   0xa   :  { %567 = vset.pattern.permute.xlu1 %v605_v4  ;;  %566 = vset.pattern.permute.xlu0 %v605_v4 }
   0xb   :  { %249 = vperm.xlu1 %567, %v27_v3   ;;  %245 = vperm.xlu0 %566, %v26_v2  }
   0xf   :  { %568 = vset.pattern.permute.xlu1 %v606_v5  ;;  %569 = vset.pattern.permute.xlu0 %v606_v5  ;;  %v519_v5 = vunpack.c.h.bf16 %v522_v55 }
  0x10   :  { %344 = vperm.xlu1 %568, %v26_v2   ;;  %348 = vperm.xlu0 %569, %v27_v3  }
  0x14   :  { %193 = vrot.lane.b32.xlu1 %v656_v6, %s607_s27 }
  0x81   :  { %v147_v23 = vpop.permute.xlu1 %146  ;;  %v38_v24 = vpop.permute.xlu0 %37 }
  0x82   :  { %v157_v26 = vadd.f32 %v156_v18, %v147_v23  ;;  %v49_v27 = vadd.f32 %v48_v19, %v38_v24 }
  0x84   :  { %v164_v29 = vadd.f32 %v510_v20, %v157_v26  ;;  %v55_v30 = vadd.f32 %v506_v21, %v49_v27 }
  0x85   :  { %v151_v35 = vpop.permute.xlu1 %150  ;;  %v43_v36 = vpop.permute.xlu0 %42 }
  0x86   :  { %v158_v37 = vadd.f32 %v156_v18, %v151_v35  ;;  %v50_v38 = vadd.f32 %v48_v19, %v43_v36  ;;  %vm57_vm3 = vcmp.gt.f32.partialorder %v55_v30, 0.0  ;;  %v59_v40 = vmul.f32 0.2, %v55_v30 }
  0x87   :  { %vm166_vm5 = vcmp.gt.f32.partialorder %v164_v29, 0.0  ;;  %v168_v42 = vmul.f32 0.2, %v164_v29 }
  0x88   :  { %v165_v43 = vadd.f32 %v511_v31, %v158_v37  ;;  %v56_v44 = vadd.f32 %v507_v32, %v50_v38  ;;  %v61_v45 = vsel %vm57_vm3, %v55_v30, %v59_v40 }
  0x89   :  { %v688_v49 = vsel %vm679_vm2, %v61_v45, -1e+30  ;;  %v170_v50 = vsel %vm166_vm5, %v164_v29, %v168_v42 }
  0x8a   :  { %v250_v52 = vpop.permute.xlu1 %249  ;;  %v246_v53 = vpop.permute.xlu0 %245  ;;  %v72_v54 = vsel %vm71_vm4, %v688_v49, -inf  ;;  %vm58_vm7 = vcmp.gt.f32.partialorder %v56_v44, 0.0  ;;  %v60_v56 = vmul.f32 0.2, %v56_v44  ;;  %v701_v59 = vsel %vm679_vm2, %v170_v50, -1e+30 }
  0x8b   :  { %v257_v57 = vadd.f32 %v255_v41, %v250_v52  ;;  %v256_v58 = vadd.f32 %v255_v41, %v246_v53  ;;  %73 = vmax.xlane.f32.xlu1 %v72_v54  ;;  %vm167_vm8 = vcmp.gt.f32.partialorder %v165_v43, 0.0  ;;  %v169_v62 = vmul.f32 0.2, %v165_v43 }
  0x8c   :  { %v62_v61 = vsel %vm58_vm7, %v56_v44, %v60_v56  ;;  %v174_v3 = vsel %vm71_vm4, %v701_v59, -inf }
  0x8d   :  { %v264_v63 = vadd.f32 %v515_v47, %v257_v57  ;;  %v263_v0 = vadd.f32 %v514_v48, %v256_v58  ;;  %v70_v2 = vsel %vm690_vm6, %v62_v61, -1e+30  ;;  %v171_v8 = vsel %vm167_vm8, %v165_v43, %v169_v62 }
  0x8e   :  { %v75_v4 = vsel %vm71_vm4, %v70_v2, -inf  ;;  %v173_v11 = vsel %vm690_vm6, %v171_v8, -1e+30 }
  0x8f   :  { %v345_v9 = vpop.permute.xlu1 %344  ;;  %175 = vmax.xlane.f32.xlu1 %v174_v3  ;;  %76 = vmax.xlane.f32.xlu0 %v75_v4  ;;  %v349_v10 = vpop.permute.xlu0 %348  ;;  %vm265_vm9 = vcmp.gt.f32.partialorder %v263_v0, 0.0  ;;  %v267_v12 = vmul.f32 0.2, %v263_v0  ;;  %vm266_vm10 = vcmp.gt.f32.partialorder %v264_v63, 0.0  ;;  %v268_v15 = vmul.f32 0.2, %v264_v63 }
  0x90   :  { %v355_v13 = vadd.f32 %v354_v60, %v345_v9  ;;  %v356_v14 = vadd.f32 %v354_v60, %v349_v10  ;;  %v177_v16 = vsel %vm71_vm4, %v173_v11, -inf }
  0x91   :  { %v269_v17 = vsel %vm265_vm9, %v263_v0, %v267_v12  ;;  %v270_v21 = vsel %vm266_vm10, %v264_v63, %v268_v15 }
  0x92   :  { %v362_v18 = vadd.f32 %v518_v1, %v355_v13  ;;  %v363_v19 = vadd.f32 %v519_v5, %v356_v14  ;;  %v271_v20 = vsel %vm679_vm2, %v269_v17, -1e+30  ;;  %v272_v23 = vsel %vm690_vm6, %v270_v21, -1e+30 }
  0x93   :  { %178 = vmax.xlane.f32.xlu0 %v177_v16  ;;  %v273_v22 = vsel %vm71_vm4, %v271_v20, -inf  ;;  %v194_v24 = vpop.permute.xlu1 %193  ;;  %v276_v27 = vsel %vm71_vm4, %v272_v23, -inf }
  0x94   :  { %274 = vmax.xlane.f32.xlu1 %v273_v22  ;;  %vm364_vm11 = vcmp.gt.f32.partialorder %v362_v18, 0.0  ;;  %v366_v25 = vmul.f32 0.2, %v362_v18  ;;  %vm365_vm12 = vcmp.gt.f32.partialorder %v363_v19, 0.0  ;;  %538 = vmatpush3.bf16.msra.mxu1 %v194_v24  ;;  %v367_v26 = vmul.f32 0.2, %v363_v19 }
  0x95   :  { %549 = vmatprep.subr.bf16.mxu1 %v608_v7 }
  0x96   :  { %v368_v28 = vsel %vm364_vm11, %v362_v18, %v366_v25  ;;  %v369_v30 = vsel %vm365_vm12, %v363_v19, %v367_v26 }
  0x97   :  { %277 = vmax.xlane.f32.xlu0 %v276_v27  ;;  %v370_v29 = vsel %vm679_vm2, %v368_v28, -1e+30  ;;  %v371_v32 = vsel %vm690_vm6, %v369_v30, -1e+30 }
  0x98   :  { %v372_v31 = vsel %vm71_vm4, %v370_v29, -inf  ;;  %v375_v33 = vsel %vm71_vm4, %v371_v32, -inf }
  0x99   :  { %373 = vmax.xlane.f32.xlu1 %v372_v31 }
  0x9b   :  { %376 = vmax.xlane.f32.xlu0 %v375_v33 }
  0xaa   :  { %391 = vrot.lane.b32.xlu1 %v656_v6, %s609_s5 }
  0xb1   :  { %292 = vrot.lane.b32.xlu0 %v656_v6, %s611_s14 }
 0x118   :  { %v74_v34 = vpop.xlane.xlu1 %73 }
 0x119   :  { %v78_v35 = vsub.f32 %v688_v49, %v74_v34 }
 0x11b   :  { %v80_v36 = vmul.f32 1.442695, %v78_v35 }
 0x11c   :  { %v176_v37 = vpop.xlane.xlu1 %175  ;;  %v77_v38 = vpop.xlane.xlu0 %76 }
 0x11d   :  { %v180_v39 = vsub.f32 %v701_v59, %v176_v37  ;;  %v79_v40 = vsub.f32 %v70_v2, %v77_v38  ;;  %571 = vpow2.f32 %v80_v36 }
 0x11f   :  { %v182_v41 = vmul.f32 1.442695, %v180_v39  ;;  %v82_v42 = vmul.f32 1.442695, %v79_v40 }
 0x120   :  { %v179_v43 = vpop.xlane.xlu0 %178 }
 0x121   :  { %573 = vpow2.f32 %v182_v41  ;;  %v181_v44 = vsub.f32 %v173_v11, %v179_v43  ;;  %v275_v45 = vpop.xlane.xlu1 %274 }
 0x122   :  { %575 = vpow2.f32 %v82_v42  ;;  %v279_v46 = vsub.f32 %v271_v20, %v275_v45 }
 0x123   :  { %v184_v47 = vmul.f32 1.442695, %v181_v44 }
 0x124   :  { %v281_v6 = vmul.f32 1.442695, %v279_v46  ;;  %v278_v48 = vpop.xlane.xlu0 %277 }
 0x125   :  { %577 = vpow2.f32 %v184_v47  ;;  %v280_v49 = vsub.f32 %v272_v23, %v278_v48 }
 0x126   :  { %v374_v50 = vpop.xlane.xlu1 %373  ;;  %579 = vpow2.f32 %v281_v6 }
 0x127   :  { %v283_v51 = vmul.f32 1.442695, %v280_v49  ;;  %v378_v52 = vsub.f32 %v370_v29, %v374_v50  ;;  %v572_v56 = vpop.eup %571 }
 0x128   :  { %v377_v53 = vpop.xlane.xlu0 %376 }
 0x129   :  { %581 = vpow2.f32 %v283_v51  ;;  %v380_v54 = vmul.f32 1.442695, %v378_v52  ;;  %v379_v55 = vsub.f32 %v371_v32, %v377_v53 }
 0x12a   :  { %v392_v0 = vpop.permute.xlu1 %391 }
 0x12b   :  { %v574_v57 = vpop.eup %573  ;;  %583 = vpow2.f32 %v380_v54  ;;  %v382_v58 = vmul.f32 1.442695, %v379_v55 }
 0x12c   :  { %v576_v59 = vpop.eup %575  ;;  %v186_v60 = vsel %vm71_vm4, %v574_v57, 0.0  ;;  %v293_v61 = vpop.permute.xlu0 %292 }
 0x12d   :  { %585 = vpow2.f32 %v382_v58  ;;  %187 = vadd.xlane.f32.xlu1 %v186_v60  ;;  %v90_v62 = vpack.c.bf16 %v576_v59, %v572_v56  ;;  %v87_v15 = vsel %vm71_vm4, %v576_v59, 0.0  ;;  %v503_v60 = vld [vmem:[%s770_s4] ss:$0 sm:$0xff] }
 0x12f   :  { %v578_v63 = vpop.eup %577  ;;  %534 = vmatmul.mubr.msk.bf16.vlgmr.msra.gmra.mrb[0].mxu0 %vm71_vm4, %v90_v62 }
 0x130   :  { %544 = vmatpush3.bf16.msra.mxu0 %v293_v61  ;;  %v189_v1 = vsel %vm71_vm4, %v578_v63, 0.0  ;;  %v192_v2 = vpack.c.bf16 %v578_v63, %v574_v57  ;;  %545 = vmatprep.mubr.msk.bf16.mxu0 %vm610_vm13, %v608_v7  ;;  %v580_v3 = vpop.eup %579 }
 0x131   :  { %190 = vadd.xlane.f32.xlu0 %v189_v1  ;;  %v285_v5 = vsel %vm71_vm4, %v580_v3, 0.0 }
 0x132   :  { %540 = vmatmul.mubr.msk.bf16.vlgmr.msra.gmra.mrb[0].mxu1 %vm71_vm4, %v192_v2 }
 0x133   :  { %v582_v4 = vpop.eup %581  ;;  %550 = vmatpush3.bf16.msra.mxu1 %v392_v0  ;;  %551 = vmatprep.mubr.msk.bf16.mxu1 %vm610_vm13, %v608_v7  ;;  %v84_v7 = vsel %vm71_vm4, %v572_v56, 0.0 }
 0x134   :  { %v288_v8 = vsel %vm71_vm4, %v582_v4, 0.0  ;;  %v291_v9 = vpack.c.bf16 %v582_v4, %v580_v3 }
 0x135   :  { %v584_v10 = vpop.eup %583  ;;  %286 = vadd.xlane.f32.xlu0 %v285_v5  ;;  %289 = vadd.xlane.f32.xlu1 %v288_v8 }
 0x136   :  { %v384_v12 = vsel %vm71_vm4, %v584_v10, 0.0 }
 0x137   :  { %v586_v11 = vpop.eup %585  ;;  %546 = vmatmul.mubr.msk.bf16.vlgmr.msra.gmra.mrb[4].mxu0 %vm71_vm4, %v291_v9 }
 0x138   :  { %v387_v13 = vsel %vm71_vm4, %v586_v11, 0.0  ;;  %v390_v14 = vpack.c.bf16 %v586_v11, %v584_v10 }
 0x139   :  { %385 = vadd.xlane.f32.xlu0 %v384_v12  ;;  %388 = vadd.xlane.f32.xlu1 %v387_v13 }
 0x13a   :  { %552 = vmatmul.mubr.msk.bf16.vlgmr.msra.gmra.mrb[4].mxu1 %vm71_vm4, %v390_v14 }
 0x13d   :  { %85 = vadd.xlane.f32.xlu0 %v84_v7  ;;  %88 = vadd.xlane.f32.xlu1 %v87_v15 }
 0x1ba   :  { %v188_v17 = vpop.xlane.xlu1 %187 }
 0x1bb   :  { %587 = vrcp.f32 %v188_v17 }
 0x1be   :  { %v191_v16 = vpop.xlane.xlu0 %190 }
 0x1bf   :  { %589 = vrcp.f32 %v191_v16 }
 0x1c2   :  { %v290_v18 = vpop.xlane.xlu1 %289  ;;  %v287_v19 = vpop.xlane.xlu0 %286 }
 0x1c3   :  { %591 = vrcp.f32 %v287_v19 }
 0x1c4   :  { %593 = vrcp.f32 %v290_v18 }
 0x1c5   :  { %v588_v25 = vpop.eup %587 }
 0x1c6   :  { %v389_v20 = vpop.xlane.xlu1 %388  ;;  %v386_v21 = vpop.xlane.xlu0 %385 }
 0x1c7   :  { %595 = vrcp.f32 %v389_v20 }
 0x1c8   :  { %597 = vrcp.f32 %v386_v21 }
 0x1c9   :  { %v590_v30 = vpop.eup %589 }
 0x1ca   :  { %v86_v49 = vpop.xlane.xlu0 %85  ;;  %v89_v50 = vpop.xlane.xlu1 %88 }
 0x1cb   :  { %599 = vrcp.f32 %v86_v49 }
 0x1cc   :  { %601 = vrcp.f32 %v89_v50 }
 0x1cd   :  { %v592_v35 = vpop.eup %591 }
 0x1ce   :  { %v594_v37 = vpop.eup %593 }
 0x1d1   :  { %v596_v43 = vpop.eup %595 }
 0x1d2   :  { %v598_v45 = vpop.eup %597 }
 0x1d5   :  { %v600_v53 = vpop.eup %599 }
 0x1d6   :  { %v602_v55 = vpop.eup %601 }
 0x202   :  { %v134_v22 = vpop.f32.mrb[0].mxu0 }
 0x203   :  { %v535_v23 = vpop.f32.mrb[1].mxu0  ;;  %v143_v56 = vmul.f32 %v600_v53, %v134_v22 }
 0x204   :  { %v137_v24 = vpop.f32.mrb[2].mxu0 }
 0x205   :  { %v536_v26 = vpop.f32.mrb[3].mxu0  ;;  %v233_v27 = vpop.f32.mrb[0].mxu1  ;;  %v144_v58 = vmul.f32 %v602_v55, %v137_v24 }
 0x206   :  { %v242_v28 = vmul.f32 %v588_v25, %v233_v27  ;;  %v541_v29 = vpop.f32.mrb[1].mxu1 }
 0x207   :  { %v236_v31 = vpop.f32.mrb[2].mxu1 }
 0x208   :  { %v243_v32 = vmul.f32 %v590_v30, %v236_v31  ;;  %v542_v33 = vpop.f32.mrb[3].mxu1  ;;  %444 = vrot.lane.b32.xlu0 %v242_v28, %s609_s5 }
 0x20a   :  { %v332_v34 = vpop.f32.mrb[4].mxu0  ;;  %446 = vrot.lane.b32.xlu1 %v243_v32, %s609_s5 }
 0x20b   :  { %v547_v36 = vpop.f32.mrb[5].mxu0  ;;  %v341_v38 = vmul.f32 %v592_v35, %v332_v34 }
 0x20c   :  { %v335_v39 = vpop.f32.mrb[6].mxu0 }
 0x20d   :  { %v342_v40 = vmul.f32 %v594_v37, %v335_v39  ;;  %v548_v41 = vpop.f32.mrb[7].mxu0  ;;  %v431_v42 = vpop.f32.mrb[4].mxu1 }
 0x20e   :  { %v553_v44 = vpop.f32.mrb[5].mxu1  ;;  %452 = vrot.lane.b32.xlu1 %v341_v38, %s611_s14  ;;  %v440_v47 = vmul.f32 %v598_v45, %v431_v42 }
 0x20f   :  { %454 = vrot.lane.b32.xlu0 %v342_v40, %s611_s14  ;;  %v434_v46 = vpop.f32.mrb[6].mxu1 }
 0x210   :  { %v441_v6 = vmul.f32 %v596_v43, %v434_v46  ;;  %v554_v48 = vpop.f32.mrb[7].mxu1 }
 0x212   :  { %460 = vrot.lane.b32.xlu1 %v440_v47, %s607_s27 }
 0x213   :  { %462 = vrot.lane.b32.xlu0 %v441_v6, %s607_s27 }
 0x27a   :  { %v445_v52 = vpop.permute.xlu0 %444 }
 0x27b   :  { %v467_v59 = vsel %vm466_vm14, %v143_v56, %v445_v52 }
 0x27c   :  { %v447_v51 = vpop.permute.xlu1 %446 }
 0x27d   :  { %v468_v61 = vsel %vm466_vm14, %v144_v58, %v447_v51 }
 0x280   :  { %v453_v54 = vpop.permute.xlu1 %452 }
 0x281   :  { %v455_v57 = vpop.permute.xlu0 %454  ;;  %v470_v62 = vsel %vm469_vm15, %v467_v59, %v453_v54 }
 0x282   :  { %v471_v0 = vsel %vm469_vm15, %v468_v61, %v455_v57 }
 0x284   :  { %v461_v63 = vpop.permute.xlu1 %460 }
 0x285   :  { %v473_v1 = vsel %vm472_vm0, %v470_v62, %v461_v63  ;;  %v463_v2 = vpop.permute.xlu0 %462 }
 0x286   :  { %v482_v3 = vadd.f32 %v503_v60, %v473_v1  ;;  %v474_v4 = vsel %vm472_vm0, %v471_v0, %v463_v2 }
 0x287   :  { %v483_v5 = vadd.f32 %v503_v60, %v474_v4 }
 0x288   :  { %v484_v8 = vmax.f32 %v482_v3, 0.0 }
 0x289   :  { %v485_v9 = vmax.f32 %v483_v5, 0.0 }
 0x28a   :  { %486 = vst [vmem:[%s771_s6] sm:$0xff] %v484_v8 }
 0x28b   :  { %487 = vst [vmem:[%s771_s6 + $0x8] sm:$0xff] %v485_v9 }

// kernel: enhanced_gat_forward.23
= control target key start
LH: loop header
LB: loop body
LE: loop exit
PB: predicated region body
PF: predicated region fallthrough
CT: control target
= control target key end

     0   :  { %v89_v0 = vmov 0.0   ;;  %vm90_vm0 = vmmov 0   ;;  %vm27_vm1 = vcmask 130048   ;;  %vm71_vm2 = vcmask 254976   ;;  %s126_s1 = inlined_call_operand.vmem [shape: f32[16,32], index: 1, kind: input, shape index: {}]   ;;  %s127_s0 = inlined_call_operand.vmem [shape: f32[2,16], index: 0, kind: input, shape index: {}]   ;;  %s128_s2 = inlined_call_operand.vmem [shape: f32[1,32], index: 2, kind: input, shape index: {}]   ;;  %s129_s3 = inlined_call_operand.vmem [shape: f32[2,32], index: 3, kind: output, shape index: {}]  }
   0x1   :  { %81 = vmatprep.subr.bf16.mxu0 %v89_v0  ;;  %v17_v1 = vld [vmem:[%s126_s1] sm:$0xff]  ;;  %v18_v2 = vld [vmem:[%s126_s1 + $0x8] sm:$0xff]  ;;  %83 = vmatprep.mubr.msk.bf16.mxu0 %vm90_vm0, %v89_v0 }
   0x2   :  { %v15_v3 = vld [vmem:[%s127_s0] sm:$0x3]  ;;  %v19_v4 = vpack.c.bf16 %v18_v2, %v17_v1 }
   0x3   :  { %v16_v5 = vpack.c.bf16 %v15_v3, %v15_v3  ;;  %v77_v6 = vld [vmem:[%s128_s2] ss:$0 sm:$0xff] }
   0x4   :  { %82 = vmatpush3.bf16.msra.mxu0 %v19_v4 }
   0x7   :  { %84 = vmatmul.mubr.msk.bf16.vlgmr.msra.gmra.mrb[0].mxu0 %vm27_vm1, %v16_v5 }
  0xda   :  { %v65_v7 = vpop.f32.mrb[0].mxu0 }
  0xdb   :  { %v66_v8 = vadd.f32 %v77_v6, %v65_v7  ;;  %v85_v9 = vpop.f32.mrb[1].mxu0 }
  0xdc   :  { %v68_v10 = vpop.f32.mrb[2].mxu0 }
  0xdd   :  { %72 = vst.msk [vmem:[%s129_s3] sm:$0x3] %vm71_vm2, %v66_v8  ;;  %v86_v11 = vpop.f32.mrb[3].mxu0 }

// kernel: enhanced_gat_forward.25
= control target key start
LH: loop header
LB: loop body
LE: loop exit
PB: predicated region body
PF: predicated region fallthrough
CT: control target
= control target key end

     0   :  { %v119_v0 = vmov 0.0   ;;  %vm120_vm0 = vmmov 0   ;;  %vm38_vm1 = vcmask 523264   ;;  %vm88_vm2 = vcmask 1024   ;;  %s174_s1 = inlined_call_operand.vmem [shape: f32[64,1], index: 1, kind: input, shape index: {}]   ;;  %s175_s2 = inlined_call_operand.<no memory space> [shape: f32[1,1], index: 2, kind: input, shape index: {}]   ;;  %s176_s0 = inlined_call_operand.vmem [shape: f32[2,64], index: 0, kind: input, shape index: {}]   ;;  %s177_s3 = inlined_call_operand.vmem [shape: f32[2,1], index: 3, kind: output, shape index: {}]  }
   0x1   :  { %101 = vmatprep.subr.bf16.mxu0 %v119_v0  ;;  %v19_v1 = vld [vmem:[%s174_s1] sm:$0xff]  ;;  %v20_v2 = vld [vmem:[%s174_s1 + $0x8] sm:$0xff]  ;;  %v21_v3 = vld [vmem:[%s174_s1 + $0x10] sm:$0xff]  ;;  %109 = vmatprep.mubr.msk.bf16.mxu0 %vm120_vm0, %v119_v0  ;;  %v8_v4 = vstv %s175_s2 }
   0x2   :  { %v27_v5 = vpack.c.bf16 %v20_v2, %v19_v1  ;;  %v22_v6 = vld [vmem:[%s174_s1 + $0x18] sm:$0xff]  ;;  %9 = vst [vmem:[#allocation2] sm:$0x1] %v8_v4  ;;  %v23_v8 = vld [vmem:[%s174_s1 + $0x20] sm:$0xff]  ;;  %v24_v9 = vld [vmem:[%s174_s1 + $0x28] sm:$0xff] }
   0x3   :  { %v28_v7 = vpack.c.bf16 %v22_v6, %v21_v3  ;;  %v29_v10 = vpack.c.bf16 %v24_v9, %v23_v8  ;;  %v25_v11 = vld [vmem:[%s174_s1 + $0x30] sm:$0xff]  ;;  %v26_v12 = vld [vmem:[%s174_s1 + $0x38] sm:$0xff]  ;;  %v17_v14 = vld [vmem:[%s176_s0] sm:$0x3] }
   0x4   :  { %102 = vmatpush3.bf16.msra.mxu0 %v27_v5  ;;  %v30_v13 = vpack.c.bf16 %v26_v12, %v25_v11  ;;  %v18_v15 = vpack.c.bf16 %v17_v14, %v17_v14 }
   0x5   :  { %103 = vmatprep.subr.bf16.mxu0 %v119_v0 }
   0x8   :  { %104 = vmatpush3.bf16.msra.mxu0 %v28_v7 }
   0x9   :  { %105 = vmatprep.subr.bf16.mxu0 %v119_v0  ;;  %v94_v16 = vld [vmem:[#allocation2] ss:$0 sm:$0xff] }
   0xc   :  { %106 = vmatpush3.bf16.msra.mxu0 %v29_v10 }
   0xd   :  { %107 = vmatprep.subr.bf16.mxu0 %v119_v0 }
  0x10   :  { %108 = vmatpush3.bf16.msra.mxu0 %v30_v13 }
  0x13   :  { %110 = vmatmul.mubr.msk.bf16.vlgmr.msra.gmra.mrb[0].mxu0 %vm38_vm1, %v18_v15 }
  0xe6   :  { %v76_v17 = vpop.f32.mrb[0].mxu0 }
  0xe7   :  { %v77_v18 = vadd.f32 %v94_v16, %v76_v17  ;;  %v111_v19 = vpop.f32.mrb[1].mxu0 }
  0xe8   :  { %v79_v20 = vpop.f32.mrb[2].mxu0 }
  0xe9   :  { %v82_v21 = vsub.f32 0.0, %v77_v18  ;;  %v112_v22 = vpop.f32.mrb[3].mxu0 }
  0xeb   :  { %v83_v23 = vmul.f32 1.442695, %v82_v21 }
  0xed   :  { %115 = vpow2.f32 %v83_v23 }
  0xf7   :  { %v116_v24 = vpop.eup %115 }
  0xf8   :  { %v85_v25 = vadd.f32 1.0, %v116_v24 }
  0xfa   :  { %117 = vrcp.f32 %v85_v25 }
 0x104   :  { %v118_v26 = vpop.eup %117 }
 0x105   :  { %89 = vst.msk [vmem:[%s177_s3] sm:$0x3] %vm88_vm2, %v118_v26 }

</bundles_post_ra>
